<compile_context>
chip_gen: v6e
topology: v6e:2x2x1
jax: 0.10.0
libtpu: 0.0.40
codegen_flags: <defaults>
</compile_context>

<pallas_src>
import math
import functools

import jax
import jax.numpy as jnp
from jax.experimental import pallas as pl
from jax.experimental.pallas import tpu as pltpu


def _round_up(n, m):
    return ((n + m - 1) // m) * m


def _cdiv(a, b):
    return -(-a // b)


def _vmem_capacity_bytes():
    try:
        info = pltpu.get_tpu_info()
        cap = getattr(info, "vmem_capacity_bytes", None)
        if cap:
            return int(cap)
    except Exception:
        pass
    return 64 << 20  # conservative fallback (v7x per-TensorCore VMEM)


def head_kernel(x_ref, e_ref, mod_ref, w_ref, bias_ref, o_ref, *, eps):
    # x tile for this (L-block, batch): (tile_l, C)
    x = x_ref[...].astype(jnp.float32)
    e = e_ref[...].astype(jnp.float32)          # (1, C) row for this batch
    mod = mod_ref[...].astype(jnp.float32)      # (2, C)

    # e = (modulation + e.unsqueeze(1)).chunk(2, dim=1) -> e0, e1 each (1, C).
    e0 = mod[0:1, :] + e
    e1 = mod[1:2, :] + e

    # LayerNorm(dim, eps, elementwise_affine=False) over the last dim (f32).
    mean = jnp.mean(x, axis=-1, keepdims=True)
    xc = x - mean
    var = jnp.mean(xc * xc, axis=-1, keepdims=True)
    xn = xc * jax.lax.rsqrt(var + eps)

    # norm(x) * (1 + e1) + e0   (repeat_e is a no-op for e of shape [B, C]).
    h = xn * (1.0 + e1) + e0

    # Linear head: cast h to the stored weight dtype (bf16 -> bf16 MXU pass),
    # accumulate in f32.
    out = jnp.dot(h.astype(w_ref.dtype), w_ref[...],
                  preferred_element_type=jnp.float32)
    out = out + bias_ref[...].astype(jnp.float32)

    o_ref[...] = out.astype(o_ref.dtype)


def head_forward(x, e, modulation, w_t, bias, *, eps=1e-6,
                 target_tile_bytes=2 << 20):
    """x: [B, L, C], e: [B, C], modulation: [2, C], w_t: [C, O], bias: [1, O]."""
    B, L, C = x.shape
    O = w_t.shape[1]

    x_isz = jnp.dtype(x.dtype).itemsize
    out_isz = x_isz
    w_isz = jnp.dtype(w_t.dtype).itemsize

    # --- Lane-dense output: pad O to a multiple of 128 (avoids masked vst). ---
    O_pad = _round_up(O, 128)
    if O_pad != O:
        w_t = jnp.pad(w_t, ((0, 0), (0, O_pad - O)))
        bias = jnp.pad(bias, ((0, 0), (0, O_pad - O)))

    w_bytes = C * O_pad * w_isz
    small_bytes = (C * jnp.dtype(e.dtype).itemsize
                   + 2 * C * jnp.dtype(modulation.dtype).itemsize
                   + O_pad * jnp.dtype(bias.dtype).itemsize)

    # --- Generation-aware VMEM budget -> max tile_l. -------------------------
    vmem_cap = _vmem_capacity_bytes()
    budget = (vmem_cap * 3) // 4  # headroom for compiler-internal scratch

    sub = 16 if x_isz == 2 else 8
    # Per-L-row VMEM cost: double-buffered x & out tiles, plus in-kernel
    # full-tile f32 temporaries (x32/xc/xn/h) and the f32 matmul result.
    per_row = 2 * C * x_isz + 2 * O_pad * out_isz + 4 * C * 4 + O_pad * 4
    avail = budget - w_bytes - 2 * small_bytes
    tile_l_max = max(sub, ((max(avail, 0) // per_row) // sub) * sub)
    # Byte target for the x tile: amortize the ~0.35 us per-grid-step overhead.
    tile_l_target = max(sub, _round_up(max(1, target_tile_bytes // (C * x_isz)), sub))
    tile_l_cap = max(sub, (min(tile_l_max, tile_l_target, 2048) // sub) * sub)

    # --- Balanced L tiling (no mostly-dead tail tile for ragged L). ----------
    n_tiles = max(1, _cdiv(L, tile_l_cap))
    if B == 1 and n_tiles == 1 and L > sub:
        # v7x megacore: leading (parallel) grid axis must be >= 2 to feed
        # both TensorCores when B == 1.
        n_tiles = 2
    tile_l = _round_up(_cdiv(L, n_tiles), sub)
    L_pad = tile_l * n_tiles
    if L_pad != L:
        # Padded rows are benign (var + eps avoids NaN) and sliced off below.
        x = jnp.pad(x, ((0, 0), (0, L_pad - L), (0, 0)))

    # e reshaped to (B, 1, C) so its per-batch block spans full (1, C) dims.
    e3 = e[:, None, :]

    # L-tile axis first so the megacore partitioner splits over L.
    grid = (n_tiles, B)

    # VMEM estimate including in-kernel full-tile temporaries.
    vmem_est = (2 * tile_l * C * x_isz
                + 2 * tile_l * O_pad * out_isz
                + w_bytes + 2 * small_bytes
                + 4 * tile_l * C * 4 + tile_l * O_pad * 4)
    vmem_limit = min(max(int(vmem_est * 1.25) + (2 << 20), 32 << 20),
                     vmem_cap - (8 << 20))
    vmem_limit = max(vmem_limit, vmem_est)

    # Constant-index operands: single-buffer (DMA'd once, never re-fetched).
    one_buf = {"pipeline_mode": pl.Buffered(1)}

    kernel = functools.partial(head_kernel, eps=eps)

    out = pl.pallas_call(
        kernel,
        out_shape=jax.ShapeDtypeStruct((B, L_pad, O_pad), x.dtype),
        grid_spec=pltpu.PrefetchScalarGridSpec(
            num_scalar_prefetch=0,
            grid=grid,
            in_specs=[
                # x tile: squeeze the batch dim, kernel sees (tile_l, C)
                pl.BlockSpec((None, tile_l, C), lambda l, b: (b, l, 0)),
                # e: per-batch (1, C) block (full last-two dims of (B,1,C))
                pl.BlockSpec((None, 1, C), lambda l, b: (b, 0, 0)),
                # modulation: full (2, C), constant index -> single buffer
                pl.BlockSpec((2, C), lambda l, b: (0, 0), **one_buf),
                # head weight transposed: full (C, O_pad), constant index
                pl.BlockSpec((C, O_pad), lambda l, b: (0, 0), **one_buf),
                # bias: full (1, O_pad), constant index
                pl.BlockSpec((1, O_pad), lambda l, b: (0, 0), **one_buf),
            ],
            out_specs=pl.BlockSpec((None, tile_l, O_pad), lambda l, b: (b, l, 0)),
        ),
        compiler_params=pltpu.CompilerParams(
            dimension_semantics=("parallel", "parallel"),
            vmem_limit_bytes=int(vmem_limit),
        ),
    )(x, e3, modulation, w_t, bias)

    return out[:, :L, :O]


def head_reference(x, e, modulation, w_t, bias, *, eps=1e-6):
    """Pure-JAX reference mirroring the PyTorch forward (e.ndim == 2 path),
    with the same mixed precision as the kernel (f32 LN, weight-dtype matmul
    operands, f32 accumulation)."""
    x32 = x.astype(jnp.float32)
    e32 = e.astype(jnp.float32)
    mod = modulation.astype(jnp.float32)
    ee = mod[None, :, :] + e32[:, None, :]        # [B, 2, C]
    e0 = ee[:, 0:1, :]                            # [B, 1, C]
    e1 = ee[:, 1:2, :]
    mean = jnp.mean(x32, axis=-1, keepdims=True)
    var = jnp.mean((x32 - mean) ** 2, axis=-1, keepdims=True)
    xn = (x32 - mean) * jax.lax.rsqrt(var + eps)
    h = xn * (1.0 + e1) + e0
    out = jnp.dot(h.astype(w_t.dtype), w_t, preferred_element_type=jnp.float32)
    out = out + bias.astype(jnp.float32)
    return out.astype(x.dtype)


if __name__ == "__main__":
    def run_case(*, dim, out_dim, patch_size, B, L, case_id):
        O = math.prod(patch_size) * out_dim
        key = jax.random.fold_in(jax.random.PRNGKey(0), case_id)
        kx, ke, km, kw, kb = jax.random.split(key, 5)

        # Activations in bf16 (HBM-bound kernel: half the x/out traffic).
        x = jax.random.normal(kx, (B, L, dim), dtype=jnp.float32).astype(jnp.bfloat16)
        e = jax.random.normal(ke, (B, dim), dtype=jnp.float32)

        # Synthetic parameters; shapes match nn.Module __init__ ((1,2,dim)
        # modulation squeezed, Linear weight [out, in] passed transposed).
        modulation = jax.random.normal(km, (2, dim), dtype=jnp.float32) * 0.02
        bound = 1.0 / math.sqrt(dim)
        w = jax.random.uniform(kw, (O, dim), minval=-bound, maxval=bound,
                               dtype=jnp.float32)
        b_ = jax.random.uniform(kb, (1, O), minval=-bound, maxval=bound,
                                dtype=jnp.float32)
        w_t = w.T.astype(jnp.bfloat16)     # bf16 MXU operand (stored dtype)
        bias = b_.astype(jnp.bfloat16)

        out = head_forward(x, e, modulation, w_t, bias, eps=1e-6)
        out = jax.block_until_ready(out)

        ref = head_reference(x, e, modulation, w_t, bias, eps=1e-6)
        assert out.shape == (B, L, O)
        assert jnp.allclose(out.astype(jnp.float32), ref.astype(jnp.float32),
                            atol=3e-2, rtol=3e-2), (
            f"mismatch vs reference (case {case_id})")

    # Case 1: lane-dense O (=128), B=2, L=512 -> balanced single L tile/batch.
    run_case(dim=128, out_dim=32, patch_size=(1, 2, 2), B=2, L=512, case_id=0)

    # Case 2: exercises O padding (96 -> 128) and ragged L (300 -> 304, not 512).
    run_case(dim=128, out_dim=24, patch_size=(1, 2, 2), B=2, L=300, case_id=1)

    # Case 3: B=1 path -> L axis leads the grid and is forced to >= 2 tiles.
    run_case(dim=128, out_dim=32, patch_size=(1, 2, 2), B=1, L=384, case_id=2)

    print("KERNEL_OK")
</pallas_src>

<mosaic_0001>
module attributes {stable_mosaic.version = 11 : i64} {
  func.func @head_kernel(%arg0: i32, %arg1: i32, %arg2: memref<1x512x128xbf16, #tpu.memory_space<vmem>>, %arg3: memref<1x1x128xf32, #tpu.memory_space<vmem>>, %arg4: memref<2x128xf32, #tpu.memory_space<vmem>>, %arg5: memref<128x128xbf16, #tpu.memory_space<vmem>>, %arg6: memref<1x128xbf16, #tpu.memory_space<vmem>>, %arg7: memref<1x512x128xbf16, #tpu.memory_space<vmem>>) attributes {dimension_semantics = [#tpu.dimension_semantics<parallel>, #tpu.dimension_semantics<parallel>], iteration_bounds = array<i64: 1, 2>, scalar_prefetch = 0 : i64, scratch_operands = 0 : i64, tpu.core_type = #tpu.core_type<tc>, window_params = [{transform_indices = @transform_0, window_bounds = array<i64: 1, 512, 128>}, {transform_indices = @transform_1, window_bounds = array<i64: 1, 1, 128>}, {pipeline_mode = #tpu.pipeline_mode<synchronous>, transform_indices = @transform_2, window_bounds = array<i64: 2, 128>}, {pipeline_mode = #tpu.pipeline_mode<synchronous>, transform_indices = @transform_3, window_bounds = array<i64: 128, 128>}, {pipeline_mode = #tpu.pipeline_mode<synchronous>, transform_indices = @transform_4, window_bounds = array<i64: 1, 128>}, {transform_indices = @transform_5, window_bounds = array<i64: 1, 512, 128>}]} {
    %c0 = arith.constant 0 : index
    %c0_0 = arith.constant 0 : index
    %c0_1 = arith.constant 0 : index
    %0 = vector.load %arg2[%c0, %c0_0, %c0_1] : memref<1x512x128xbf16, #tpu.memory_space<vmem>>, vector<1x512x128xbf16>
    %1 = vector.shape_cast %0 : vector<1x512x128xbf16> to vector<512x128xbf16>
    %2 = arith.extf %1 : vector<512x128xbf16> to vector<512x128xf32>
    %c0_2 = arith.constant 0 : index
    %c0_3 = arith.constant 0 : index
    %c0_4 = arith.constant 0 : index
    %3 = vector.load %arg3[%c0_2, %c0_3, %c0_4] : memref<1x1x128xf32, #tpu.memory_space<vmem>>, vector<1x1x128xf32>
    %4 = vector.shape_cast %3 : vector<1x1x128xf32> to vector<1x128xf32>
    %c0_5 = arith.constant 0 : index
    %c0_6 = arith.constant 0 : index
    %5 = vector.load %arg4[%c0_5, %c0_6] : memref<2x128xf32, #tpu.memory_space<vmem>>, vector<2x128xf32>
    %6 = vector.extract_strided_slice %5 {offsets = [0, 0], sizes = [1, 128], strides = [1, 1]} : vector<2x128xf32> to vector<1x128xf32>
    %7 = arith.addf %6, %4 : vector<1x128xf32>
    %8 = vector.extract_strided_slice %5 {offsets = [1, 0], sizes = [1, 128], strides = [1, 1]} : vector<2x128xf32> to vector<1x128xf32>
    %9 = arith.addf %8, %4 : vector<1x128xf32>
    %cst = arith.constant dense<0.000000e+00> : vector<512xf32>
    %10 = vector.multi_reduction <add>, %2, %cst [1] : vector<512x128xf32> to vector<512xf32>
    %11 = vector.shape_cast %10 : vector<512xf32> to vector<512x1xf32>
    %cst_7 = arith.constant 1.280000e+02 : f32
    %12 = vector.broadcast %cst_7 : f32 to vector<512x1xf32>
    %13 = arith.divf %11, %12 : vector<512x1xf32>
    %14 = vector.broadcast %13 : vector<512x1xf32> to vector<512x128xf32>
    %15 = arith.subf %2, %14 : vector<512x128xf32>
    %16 = arith.mulf %15, %15 : vector<512x128xf32>
    %cst_8 = arith.constant dense<0.000000e+00> : vector<512xf32>
    %17 = vector.multi_reduction <add>, %16, %cst_8 [1] : vector<512x128xf32> to vector<512xf32>
    %18 = vector.shape_cast %17 : vector<512xf32> to vector<512x1xf32>
    %cst_9 = arith.constant 1.280000e+02 : f32
    %19 = vector.broadcast %cst_9 : f32 to vector<512x1xf32>
    %20 = arith.divf %18, %19 : vector<512x1xf32>
    %cst_10 = arith.constant 9.99999997E-7 : f32
    %21 = vector.broadcast %cst_10 : f32 to vector<512x1xf32>
    %22 = arith.addf %20, %21 : vector<512x1xf32>
    %23 = math.rsqrt %22 : vector<512x1xf32>
    %24 = vector.broadcast %23 : vector<512x1xf32> to vector<512x128xf32>
    %25 = arith.mulf %15, %24 : vector<512x128xf32>
    %cst_11 = arith.constant 1.000000e+00 : f32
    %26 = vector.broadcast %cst_11 : f32 to vector<1x128xf32>
    %27 = arith.addf %26, %9 : vector<1x128xf32>
    %28 = vector.broadcast %27 : vector<1x128xf32> to vector<512x128xf32>
    %29 = arith.mulf %25, %28 : vector<512x128xf32>
    %30 = vector.broadcast %7 : vector<1x128xf32> to vector<512x128xf32>
    %31 = arith.addf %29, %30 : vector<512x128xf32>
    %32 = arith.truncf %31 : vector<512x128xf32> to vector<512x128xbf16>
    %c0_12 = arith.constant 0 : index
    %c0_13 = arith.constant 0 : index
    %33 = vector.load %arg5[%c0_12, %c0_13] : memref<128x128xbf16, #tpu.memory_space<vmem>>, vector<128x128xbf16>
    %cst_14 = arith.constant dense<0.000000e+00> : vector<512x128xf32>
    %34 = tpu.matmul %32, %33, %cst_14 {dimension_numbers = #tpu.dot_dimension_numbers<[1], [0], [0], [1], [0, 0, 1, 1], [], []>} : vector<512x128xbf16>, vector<128x128xbf16>, vector<512x128xf32> -> vector<512x128xf32>
    %c0_15 = arith.constant 0 : index
    %c0_16 = arith.constant 0 : index
    %35 = vector.load %arg6[%c0_15, %c0_16] : memref<1x128xbf16, #tpu.memory_space<vmem>>, vector<1x128xbf16>
    %36 = arith.extf %35 : vector<1x128xbf16> to vector<1x128xf32>
    %37 = vector.broadcast %36 : vector<1x128xf32> to vector<512x128xf32>
    %38 = arith.addf %34, %37 : vector<512x128xf32>
    %39 = arith.truncf %38 : vector<512x128xf32> to vector<512x128xbf16>
    %c0_17 = arith.constant 0 : index
    %c0_18 = arith.constant 0 : index
    %c0_19 = arith.constant 0 : index
    %40 = vector.load %arg7[%c0_17, %c0_18, %c0_19] : memref<1x512x128xbf16, #tpu.memory_space<vmem>>, vector<1x512x128xbf16>
    %41 = vector.shape_cast %40 : vector<1x512x128xbf16> to vector<512x128xbf16>
    %42 = vector.shape_cast %39 : vector<512x128xbf16> to vector<1x512x128xbf16>
    tpu.vector_store %arg7[%c0_17, %c0_18, %c0_19], %42 {strides = array<i32>} : memref<1x512x128xbf16, #tpu.memory_space<vmem>>, vector<1x512x128xbf16>,
    return
  }
  func.func @transform_0(%arg0: i32, %arg1: i32) -> (i32, i32, i32) {
    %c0_i32 = arith.constant 0 : i32
    %c0_i32_0 = arith.constant 0 : i32
    return %arg1, %arg0, %c0_i32 : i32, i32, i32
  }
  func.func @transform_1(%arg0: i32, %arg1: i32) -> (i32, i32, i32) {
    %c0_i32 = arith.constant 0 : i32
    %c0_i32_0 = arith.constant 0 : i32
    %c0_i32_1 = arith.constant 0 : i32
    return %arg1, %c0_i32, %c0_i32_0 : i32, i32, i32
  }
  func.func @transform_2(%arg0: i32, %arg1: i32) -> (i32, i32) {
    %c0_i32 = arith.constant 0 : i32
    %c0_i32_0 = arith.constant 0 : i32
    %c0_i32_1 = arith.constant 0 : i32
    return %c0_i32, %c0_i32_0 : i32, i32
  }
  func.func @transform_3(%arg0: i32, %arg1: i32) -> (i32, i32) {
    %c0_i32 = arith.constant 0 : i32
    %c0_i32_0 = arith.constant 0 : i32
    %c0_i32_1 = arith.constant 0 : i32
    return %c0_i32, %c0_i32_0 : i32, i32
  }
  func.func @transform_4(%arg0: i32, %arg1: i32) -> (i32, i32) {
    %c0_i32 = arith.constant 0 : i32
    %c0_i32_0 = arith.constant 0 : i32
    %c0_i32_1 = arith.constant 0 : i32
    return %c0_i32, %c0_i32_0 : i32, i32
  }
  func.func @transform_5(%arg0: i32, %arg1: i32) -> (i32, i32, i32) {
    %c0_i32 = arith.constant 0 : i32
    %c0_i32_0 = arith.constant 0 : i32
    return %arg1, %arg0, %c0_i32 : i32, i32, i32
  }
}

</mosaic_0001>

<bundles_post_ra>
// kernel: tpu_custom_call.1
= control target key start
LH: loop header
LB: loop body
LE: loop exit
PB: predicated region body
PF: predicated region fallthrough
CT: control target
= control target key end

     0   :  { %s4400_s0 = inlined_call_operand.hbm [shape: bf16[2,512,128], index: 0, kind: input, shape index: {}]   ;;  %s4401_s1 = inlined_call_operand.hbm [shape: f32[2,1,128], index: 1, kind: input, shape index: {}]   ;;  %s4402_s2 = inlined_call_operand.vmem [shape: f32[2,128], index: 2, kind: input, shape index: {}]   ;;  %s4403_s3 = inlined_call_operand.hbm [shape: bf16[128,128], index: 3, kind: input, shape index: {}]   ;;  %s4404_s4 = inlined_call_operand.vmem [shape: bf16[1,128], index: 4, kind: input, shape index: {}]   ;;  %s4405_s5 = inlined_call_operand.hbm [shape: bf16[2,512,128], index: 5, kind: output, shape index: {}]  }
   0x1   :  { %4481 = sst [smem:[#allocation42_spill]] %s4400_s0 }
   0x2   :  { %4482 = sst [smem:[#allocation43_spill]] %s4403_s3 }
   0x3   :  { %10 = vsyncpa [#allocation3], 0 }
   0x4   :  { %12 = vsyncpa [#allocation3 + $0x1], 0 }
   0x5   :  { %13 = vsyncpa [#allocation6], 0 }
   0x6   :  { %15 = vsyncpa [#allocation6 + $0x1], 0 }
   0x7   :  { %16 = vsyncpa [#allocation4], 0 }
   0x8   :  { %18 = vsyncpa [#allocation4 + $0x1], 0  ;;  %s3205_s18 = smov 0   ;;  %s3207_s19 = smov 0  }
   0x9   :  { %s3209_s20 = smov 0   ;;  %s3211_s21 = smov 0  }
   0xa   :  { %s3213_s22 = smov 0   ;;  %s3215_s23 = smov 0  }
   0xb LB: > { %4483 = sst [smem:[#allocation13_spill]] %s3153_s20  ;;  %s3236_s24 = sadd.s32 4294967295, %s3165_s23   ;;  %s3165_s23 = sphi %s3215_s23, %s24_s23   ;;  %s3161_s22 = sphi %s3213_s22, %s4601_s22   ;;  %s3157_s21 = sphi %s3211_s21, %s4600_s21   ;;  %s3153_s20 = sphi %s3209_s20, %s4596_s20   ;;  %s3149_s19 = sphi %s3207_s19, %s4599_s19   ;;  %s3145_s18 = sphi %s3205_s18, %s4598_s18  }
   0xc   : > { %4484 = sst [smem:[#allocation14_spill]] %s3165_s23  ;;  %s2136_s25 = sadd.s32 4294967294, %s3165_s23  }
   0xd   : > { %p58_p0 = scmp.ne.s32.totalorder %s3149_s19, %s3145_s18  ;;  %p59_p1 = scmp.eq.s32.totalorder %s3236_s24, 0 }
   0xe   : > { %p179_p3 = scmp.eq.s32.totalorder %s2136_s25, 1  ;;  %p2137_p5 = scmp.ge.s32.totalorder %s3165_s23, 1 }
   0xf   : > { %p3245_p4 = por %p59_p1, %p58_p0  ;;  %p186_p7 = scmp.lt.s32.totalorder %s3165_s23, 3 }
  0x10   : > { %p3250_p6 = por %p179_p3, %p58_p0  ;;  %s3167_s29 = smov [#allocation7]  }
  0x11   : > { %p3255_p8 = pnand %p2137_p5, %p186_p7  ;;  %s201_s30 = sshll.u32 %s3167_s29, 4  ;;  %s202_s30 = int_to_ptr.vmem [resolvable:$true] %s201_s30 }
  0x12   : > { %s4486_s27 = scalar_select %p3250_p6, 1, 0 }
  0x13   : > { %p2787_p9 = pneg %p3255_p8  ;;  %p2139_p10 = scmp.ge.s32.totalorder %s3165_s23, 2 }
  0x14   : > { %4487 = sst [smem:[#allocation15_spill]] %s4486_s27  ;;  %s33_s7 = sadd.s32 1, %s3161_s22 }
  0x15   : > { %p3264_p11 = pnand %p2787_p9, %p59_p1  ;;  %s3006_s8 = scalar_lea.vmem %s202_s30, 1024 }
  0x16   : > { %p3007_p13 = scmp.ne.s32.totalorder %s202_s30, %s3006_s8  ;;  %p3014_p5 = scmp.lt.s32.totalorder %s202_s30, %s202_s30 }
  0x17   : > { %p2997_p12 = pneg %p3264_p11  ;;  %p3015_p7 = scmp.lt.s32.totalorder %s3006_s8, %s3006_s8 }
  0x19   : > { %p3009_p0 = pnand %p3007_p13, %p2997_p12  ;;  %p3016_p2 = por %p3015_p7, %p3014_p5 }
  0x1b   : > { %p3010_p3 = pneg %p3009_p0 }
  0x1d   : > { %p3017_p6 = pnand %p3016_p2, %p3010_p3 }
  0x1f   : > { %3020 = shalt.err (!%p3017_p6)
}
  0x20   : > { %s4406_s9 = smov 64   ;;  %s4407_s10 = smov 4  }
  0x21   : > { %s4490_s3 = sld [smem:[#allocation43_spill]]  ;;  %p34_p2 = scmp.ge.s32.totalorder %s33_s7, 2 }
  0x22   : > { %s45_s13 = sadd.s32 1, %s3153_s20  ;;  %p52_p6 = scmp.ne.s32.totalorder %s3153_s20, %s3149_s19 }
  0x23   : > { %p53_p9 = scmp.eq.s32.totalorder %s3165_s23, 0  ;;  %s4603_s7 = smov (%p34_p2, %s33_s7), 0 }
  0x24   : > { %4491 = sst [smem:[#allocation16_spill]] %s4603_s7  ;;  %p4493_p13 = scmp.eq.s32.totalorder %s3236_s24, 1 }
  0x25   : > { %p3285_p12 = por %p53_p9, %p52_p6  ;;  %s40_s16 = ssub.s32 %s3161_s22, %s4603_s7 }
  0x26   : > { %p3291_p0 = por %p4493_p13, %p52_p6  ;;  %p43_p3 = scmp.eq.s32.totalorder %s40_s16, 0 }
  0x27   : > { %2790 = dma.hbm_to_vmem [thread:$0]  (!%p3264_p11), %s4490_s3, 1024, %s202_s30, [#allocation6], %s4406_s9, %s4406_s9, %s4407_s10  }
  0x28   : > { %p2803_p11 = scmp.lt.s32.totalorder %s3165_s23, 2  ;;  %s3299_s17 = sand.u32 1, %s3153_s20  }
  0x29   : > { %s2140_s25 = sshll.u32 %s3299_s17, 8  ;;  %s2225_s30 = sshll.u32 %s3161_s22, 12 }
  0x2a   : > { %s3303_s29 = scalar_select %p43_p3, %s3153_s20, %s45_s13  }
  0x2b   : > { %s4496_s0 = sld [smem:[#allocation42_spill]]  ;;  %s222_s12 = scalar_lea.vmem [#allocation2], %s2140_s25 }
  0x2c   : > { %4495 = sst [smem:[#allocation17_spill]] %s3303_s29  ;;  %s231_s9 = sshll.u32 %s222_s12, 4  ;;  %s232_s9 = int_to_ptr.vmem [resolvable:$true] %s231_s9 }
  0x2d   : > { %p3311_p5 = pnand %p2803_p11, %p3285_p12  ;;  %s241_s16 = sand.u32 1, %s3165_s23  }
  0x2e   : > { %s219_s3 = scalar_lea.sflag [#allocation3], %s3299_s17  ;;  %s3034_s13 = scalar_lea.vmem %s232_s9, 4096 }
  0x2f   : > { %p3023_p7 = pneg %p3311_p5  ;;  %p3035_p2 = scmp.ne.s32.totalorder %s232_s9, %s3034_s13 }
  0x30   : > { %s3170_s25 = smov [#allocation2]  }
  0x31   : > { %s230_s11 = scalar_lea.hbm %s4496_s0, %s2225_s30  ;;  %p3037_p6 = pnand %p3035_p2, %p3023_p7 }
  0x32   : > { %s3039_s30 = sshll.u32 %s3170_s25, 4  ;;  %s3040_s30 = int_to_ptr.vmem [resolvable:$false] %s3039_s30 }
  0x33   : > { %p3038_p9 = pneg %p3037_p6  ;;  %s3041_s14 = scalar_lea.vmem %s3040_s30, 8192 }
  0x34   : > { %p3042_p12 = scmp.lt.s32.totalorder %s232_s9, %s3040_s30  ;;  %p3043_p13 = scmp.lt.s32.totalorder %s3041_s14, %s3034_s13 }
  0x36   : > { %p3044_p11 = por %p3043_p13, %p3042_p12 }
  0x38   : > { %p3045_p3 = pnand %p3044_p11, %p3038_p9 }
  0x3a   : > { %3048 = shalt.err (!%p3045_p3)
}
  0x3b   : > { %s4498_s6 = smov 4   ;;  %s4499_s8 = smov 64  }
  0x3c   : > { %2794 = dma.hbm_to_vmem [thread:$0]  (!%p3311_p5), %s230_s11, 4096, %s232_s9, %s219_s3, %s4499_s8, %s4499_s8, %s4498_s6  }
  0x3d   : > { %s2143_s12 = sshll.u32 %s3161_s22, 4  ;;  %s244_s0 = scalar_lea.vmem [#allocation5], %s3299_s17 }
  0x3e   : > { %s251_s7 = sshll.u32 %s244_s0, 4  ;;  %s249_s30 = scalar_lea.hbm %s4401_s1, %s2143_s12  ;;  %s252_s7 = int_to_ptr.vmem [resolvable:$true] %s251_s7 }
  0x3f   : > { %s242_s13 = scalar_lea.sflag [#allocation6], %s241_s16  ;;  %s3062_s14 = scalar_lea.vmem %s252_s7, 16 }
  0x40   : > { %p3063_p2 = scmp.ne.s32.totalorder %s252_s7, %s3062_s14  ;;  %s3171_s20 = smov [#allocation5]  }
  0x41   : > { %s3067_s23 = sshll.u32 %s3171_s20, 4  ;;  %s3068_s23 = int_to_ptr.vmem [resolvable:$false] %s3067_s23 }
  0x42   : > { %p3065_p6 = pnand %p3063_p2, %p3023_p7  ;;  %s3069_s27 = scalar_lea.vmem %s3068_s23, 32 }
  0x43   : > { %p3070_p12 = scmp.lt.s32.totalorder %s252_s7, %s3068_s23  ;;  %p3071_p13 = scmp.lt.s32.totalorder %s3069_s27, %s3062_s14 }
  0x44   : > { %p3066_p9 = pneg %p3065_p6 }
  0x45   : > { %p3072_p11 = por %p3071_p13, %p3070_p12 }
  0x47   : > { %p3073_p3 = pnand %p3072_p11, %p3066_p9 }
  0x49   : > { %3076 = shalt.err (!%p3073_p3)
}
  0x4a   : > { %2797 = dma.hbm_to_vmem [thread:$0]  (!%p3311_p5), %s249_s30, 16, %s252_s7, %s242_s13  }
  0x4b   : > { %260 = sbr.rel (%p3255_p8) target bundleno = 745 (0x2e9), region = 40 }
  0x50   : > { %s3340_s0 = sand.u32 1, %s3149_s19  }
  0x51   : > { %s2145_s3 = sshll.u32 %s3340_s0, 8  ;;  %s263_s20 = scalar_lea.sflag [#allocation3], %s3340_s0 }
  0x52   : > { %s3346_s23 = scalar_lea.vmem [#allocation2], %s2145_s3 }
  0x53   : > { %3128 = dma.done.wait (%p3245_p4), %s263_s20, 4096  }
  0x54   : > { %3130 = vsyncadd (%p3245_p4), %s263_s20, 4294963200  ;;  %s271_s27 = sand.u32 1, %s3236_s24   ;;  %s274_s7 = scalar_lea.vmem [#allocation5], %s3340_s0 }
  0x55   : > { %s272_s28 = scalar_lea.sflag [#allocation6], %s271_s27 }
  0x56   : > { %3132 = dma.done.wait (%p3245_p4), %s272_s28, 16  }
  0x57   : > { %3134 = vsyncadd (%p3245_p4), %s272_s28, 4294967280 }
  0x58   : > { %3136 = dma.done.wait (%p59_p1), [#allocation6], 1024  }
  0x59   : > { %3138 = vsyncadd (%p59_p1), [#allocation6], 4294966272  ;;  %v3363_v0 = vld [vmem:[%s3346_s23] sm:$0xff]   ;;  %v3377_v6 = vld [vmem:[%s3346_s23 + $0x8] sm:$0xff]   ;;  %s4251_s17 = scalar_lea.vmem [#allocation8], %s2145_s3  ;;  %s2290_s29 = sshll.u32 %s3157_s21, 12 }
  0x5a   : > { %v3366_v1 = vld [vmem:[%s3346_s23 + $0x80] sm:$0xff]   ;;  %v2293_v2 = vunpack.c.l.bf16 %v3363_v0  ;;  %v2294_v4 = vunpack.c.h.bf16 %v3363_v0  ;;  %v2297_v7 = vunpack.c.l.bf16 %v3377_v6  ;;  %v2298_v8 = vunpack.c.h.bf16 %v3377_v6  ;;  %v3386_v9 = vld [vmem:[%s3346_s23 + $0x88] sm:$0xff]   ;;  %v3389_v10 = vld [vmem:[%s3346_s23 + $0x10] sm:$0xff]   ;;  %s2019_s11 = sshll.u32 %s4251_s17, 4  ;;  %s4348_s8 = scalar_lea.hbm %s4405_s5, %s2290_s29  ;;  %s4350_s11 = int_to_ptr.vmem [resolvable:$true] %s2019_s11 }
  0x5b   : > { %v2357_v3 = vunpack.c.l.bf16 %v3366_v1  ;;  %v2358_v5 = vunpack.c.h.bf16 %v3366_v1  ;;  %v2361_v11 = vunpack.c.l.bf16 %v3386_v9  ;;  %v2362_v12 = vunpack.c.h.bf16 %v3386_v9  ;;  %v3404_v15 = vld [vmem:[%s3346_s23 + $0x90] sm:$0xff]   ;;  %v3413_v18 = vld [vmem:[%s3346_s23 + $0x18] sm:$0xff]   ;;  %v3431_v24 = vld [vmem:[%s3346_s23 + $0x20] sm:$0xff]   ;;  %s2004_s21 = scalar_lea.sflag [#allocation4], %s3340_s0  ;;  %s3077_s12 = scalar_lea.vmem %s4350_s11, 4096 }
  0x5c   : > { %450 = vadd.xlane.f32.xlu0 %v2293_v2  ;;  %v2301_v13 = vunpack.c.l.bf16 %v3389_v10  ;;  %v2302_v14 = vunpack.c.h.bf16 %v3389_v10  ;;  %v2365_v16 = vunpack.c.l.bf16 %v3404_v15  ;;  %v2366_v17 = vunpack.c.h.bf16 %v3404_v15  ;;  %v3422_v21 = vld [vmem:[%s3346_s23 + $0x98] sm:$0xff]   ;;  %v3440_v27 = vld [vmem:[%s3346_s23 + $0xa0] sm:$0xff]   ;;  %v3449_v30 = vld [vmem:[%s3346_s23 + $0x28] sm:$0xff]   ;;  %p3078_p1 = scmp.ne.s32.totalorder %s4350_s11, %s3077_s12  ;;  %s3172_s25 = smov [#allocation8]  }
  0x5d   : > { %514 = vadd.xlane.f32.xlu1 %v2357_v3  ;;  %v2305_v19 = vunpack.c.l.bf16 %v3413_v18  ;;  %v2306_v20 = vunpack.c.h.bf16 %v3413_v18  ;;  %v2369_v22 = vunpack.c.l.bf16 %v3422_v21  ;;  %v2370_v23 = vunpack.c.h.bf16 %v3422_v21  ;;  %v3458_v33 = vld [vmem:[%s3346_s23 + $0xa8] sm:$0xff]   ;;  %v3467_v36 = vld [vmem:[%s3346_s23 + $0x30] sm:$0xff]   ;;  %v3485_v42 = vld [vmem:[%s3346_s23 + $0x38] sm:$0xff]   ;;  %s3081_s30 = sshll.u32 %s3172_s25, 4  ;;  %s3082_s30 = int_to_ptr.vmem [resolvable:$false] %s3081_s30 }
  0x5e   : > { %v2309_v25 = vunpack.c.l.bf16 %v3431_v24  ;;  %v2310_v26 = vunpack.c.h.bf16 %v3431_v24  ;;  %v2373_v28 = vunpack.c.l.bf16 %v3440_v27  ;;  %v2374_v29 = vunpack.c.h.bf16 %v3440_v27  ;;  %v3476_v39 = vld [vmem:[%s3346_s23 + $0xb0] sm:$0xff]   ;;  %v3494_v45 = vld [vmem:[%s3346_s23 + $0xb8] sm:$0xff]   ;;  %v3503_v48 = vld [vmem:[%s3346_s23 + $0x40] sm:$0xff]   ;;  %p3079_p4 = pnand %p3078_p1, %p3291_p0  ;;  %s3083_s13 = scalar_lea.vmem %s3082_s30, 8192 }
  0x5f   : > { %v4455_v31 = vunpack.c.l.bf16 %v3449_v30  ;;  %v4453_v32 = vunpack.c.h.bf16 %v3449_v30  ;;  %v4452_v34 = vunpack.c.l.bf16 %v3458_v33  ;;  %v4451_v35 = vunpack.c.h.bf16 %v3458_v33  ;;  %v3512_v51 = vld [vmem:[%s3346_s23 + $0xc0] sm:$0xff]   ;;  %v3521_v54 = vld [vmem:[%s3346_s23 + $0x48] sm:$0xff]   ;;  %v3539_v60 = vld [vmem:[%s3346_s23 + $0x50] sm:$0xff]   ;;  %p3084_p5 = scmp.lt.s32.totalorder %s4350_s11, %s3082_s30  ;;  %p3085_p7 = scmp.lt.s32.totalorder %s3083_s13, %s3077_s12 }
  0x60   : > { %452 = vadd.xlane.f32.xlu0 %v2294_v4  ;;  %v4448_v37 = vunpack.c.l.bf16 %v3467_v36  ;;  %v4447_v38 = vunpack.c.h.bf16 %v3467_v36  ;;  %v4444_v40 = vunpack.c.l.bf16 %v3476_v39  ;;  %v4441_v41 = vunpack.c.h.bf16 %v3476_v39  ;;  %v3530_v57 = vld [vmem:[%s3346_s23 + $0xc8] sm:$0xff]   ;;  %v3548_v63 = vld [vmem:[%s3346_s23 + $0xd0] sm:$0xff]   ;;  %p3080_p8 = pneg %p3079_p4 }
  0x61   : > { %516 = vadd.xlane.f32.xlu1 %v2358_v5  ;;  %v4438_v43 = vunpack.c.l.bf16 %v3485_v42  ;;  %v4436_v44 = vunpack.c.h.bf16 %v3485_v42  ;;  %v4433_v46 = vunpack.c.l.bf16 %v3494_v45  ;;  %v4430_v47 = vunpack.c.h.bf16 %v3494_v45  ;;  %p3086_p2 = por %p3085_p7, %p3084_p5 }
  0x62   : > { %v4427_v49 = vunpack.c.l.bf16 %v3503_v48  ;;  %v4424_v50 = vunpack.c.h.bf16 %v3503_v48  ;;  %v4421_v52 = vunpack.c.l.bf16 %v3512_v51  ;;  %v4418_v53 = vunpack.c.h.bf16 %v3512_v51 }
  0x63   : > { %v4415_v55 = vunpack.c.l.bf16 %v3521_v54  ;;  %v4413_v56 = vunpack.c.h.bf16 %v3521_v54  ;;  %v4414_v58 = vunpack.c.l.bf16 %v3530_v57  ;;  %v4416_v59 = vunpack.c.h.bf16 %v3530_v57  ;;  %p3087_p6 = pnand %p3086_p2, %p3080_p8 }
  0x64   : > { %454 = vadd.xlane.f32.xlu0 %v2297_v7  ;;  %v4417_v61 = vunpack.c.l.bf16 %v3539_v60  ;;  %v4419_v62 = vunpack.c.h.bf16 %v3539_v60  ;;  %v4500_v27 = vunpack.c.l.bf16 %v3449_v30 }
  0x65   : > { %456 = vadd.xlane.f32.xlu1 %v2298_v8 }
  0x68   : > { %518 = vadd.xlane.f32.xlu0 %v2361_v11 }
  0x69   : > { %520 = vadd.xlane.f32.xlu1 %v2362_v12 }
  0x6c   : > { %458 = vadd.xlane.f32.xlu0 %v2301_v13 }
  0x6d   : > { %460 = vadd.xlane.f32.xlu1 %v2302_v14 }
  0x70   : > { %522 = vadd.xlane.f32.xlu0 %v2365_v16 }
  0x71   : > { %524 = vadd.xlane.f32.xlu1 %v2366_v17 }
  0x74   : > { %462 = vadd.xlane.f32.xlu0 %v2305_v19 }
  0x75   : > { %464 = vadd.xlane.f32.xlu1 %v2306_v20 }
  0x78   : > { %526 = vadd.xlane.f32.xlu0 %v2369_v22 }
  0x79   : > { %528 = vadd.xlane.f32.xlu1 %v2370_v23 }
  0x7c   : > { %466 = vadd.xlane.f32.xlu0 %v2309_v25 }
  0x7d   : > { %468 = vadd.xlane.f32.xlu1 %v2310_v26 }
  0x80   : > { %530 = vadd.xlane.f32.xlu0 %v2373_v28 }
  0x81   : > { %532 = vadd.xlane.f32.xlu1 %v2374_v29 }
  0x84   : > { %470 = vadd.xlane.f32.xlu0 %v4455_v31 }
  0x85   : > { %472 = vadd.xlane.f32.xlu1 %v4453_v32 }
  0x88   : > { %534 = vadd.xlane.f32.xlu0 %v4452_v34 }
  0x89   : > { %536 = vadd.xlane.f32.xlu1 %v4451_v35 }
  0x8c   : > { %474 = vadd.xlane.f32.xlu0 %v4448_v37 }
  0x8d   : > { %476 = vadd.xlane.f32.xlu1 %v4447_v38 }
  0x90   : > { %538 = vadd.xlane.f32.xlu0 %v4444_v40 }
  0x91   : > { %540 = vadd.xlane.f32.xlu1 %v4441_v41 }
  0x94   : > { %478 = vadd.xlane.f32.xlu0 %v4438_v43 }
  0x95   : > { %480 = vadd.xlane.f32.xlu1 %v4436_v44  ;;  %v3620_v44 = vld [vmem:[%s3346_s23 + $0xf0] sm:$0xff]  }
  0x96   : > { %v4445_v43 = vunpack.c.h.bf16 %v3620_v44 }
  0x98   : > { %542 = vadd.xlane.f32.xlu0 %v4433_v46  ;;  %v3611_v46 = vld [vmem:[%s3346_s23 + $0x70] sm:$0xff]  }
  0x99   : > { %544 = vadd.xlane.f32.xlu1 %v4430_v47  ;;  %v3602_v47 = vld [vmem:[%s3346_s23 + $0xe8] sm:$0xff]  }
  0x9c   : > { %482 = vadd.xlane.f32.xlu0 %v4427_v49  ;;  %v3593_v49 = vld [vmem:[%s3346_s23 + $0x68] sm:$0xff]  }
  0x9d   : > { %484 = vadd.xlane.f32.xlu1 %v4424_v50  ;;  %v3584_v50 = vld [vmem:[%s3346_s23 + $0xe0] sm:$0xff]  }
  0xa0   : > { %546 = vadd.xlane.f32.xlu0 %v4421_v52  ;;  %v3575_v52 = vld [vmem:[%s3346_s23 + $0x60] sm:$0xff]  }
  0xa1   : > { %548 = vadd.xlane.f32.xlu1 %v4418_v53  ;;  %v3566_v53 = vld [vmem:[%s3346_s23 + $0xd8] sm:$0xff]  }
  0xa4   : > { %486 = vadd.xlane.f32.xlu0 %v4415_v55  ;;  %v3557_v55 = vld [vmem:[%s3346_s23 + $0x58] sm:$0xff]  }
  0xa5   : > { %488 = vadd.xlane.f32.xlu1 %v4413_v56  ;;  %v4420_v56 = vunpack.c.l.bf16 %v3548_v63 }
  0xa8   : > { %550 = vadd.xlane.f32.xlu0 %v4414_v58  ;;  %v4422_v58 = vunpack.c.h.bf16 %v3548_v63 }
  0xa9   : > { %552 = vadd.xlane.f32.xlu1 %v4416_v59  ;;  %v4423_v59 = vunpack.c.l.bf16 %v3557_v55 }
  0xac   : > { %490 = vadd.xlane.f32.xlu0 %v4417_v61  ;;  %v4425_v61 = vunpack.c.h.bf16 %v3557_v55 }
  0xad   : > { %492 = vadd.xlane.f32.xlu1 %v4419_v62  ;;  %v4426_v62 = vunpack.c.l.bf16 %v3566_v53 }
  0xb0   : > { %554 = vadd.xlane.f32.xlu0 %v4420_v56  ;;  %v4428_v56 = vunpack.c.h.bf16 %v3566_v53 }
  0xb1   : > { %556 = vadd.xlane.f32.xlu1 %v4422_v58  ;;  %v4429_v58 = vunpack.c.l.bf16 %v3575_v52 }
  0xb4   : > { %494 = vadd.xlane.f32.xlu0 %v4423_v59  ;;  %v4431_v59 = vunpack.c.h.bf16 %v3575_v52 }
  0xb5   : > { %496 = vadd.xlane.f32.xlu1 %v4425_v61  ;;  %v4432_v61 = vunpack.c.l.bf16 %v3584_v50 }
  0xb8   : > { %558 = vadd.xlane.f32.xlu0 %v4426_v62  ;;  %v4434_v62 = vunpack.c.h.bf16 %v3584_v50 }
  0xb9   : > { %560 = vadd.xlane.f32.xlu1 %v4428_v56  ;;  %v4435_v56 = vunpack.c.l.bf16 %v3593_v49 }
  0xbc   : > { %498 = vadd.xlane.f32.xlu0 %v4429_v58  ;;  %v4437_v58 = vunpack.c.h.bf16 %v3593_v49 }
  0xbd   : > { %500 = vadd.xlane.f32.xlu1 %v4431_v59  ;;  %v4439_v59 = vunpack.c.l.bf16 %v3602_v47 }
  0xc0   : > { %562 = vadd.xlane.f32.xlu0 %v4432_v61  ;;  %v4440_v61 = vunpack.c.h.bf16 %v3602_v47 }
  0xc1   : > { %564 = vadd.xlane.f32.xlu1 %v4434_v62  ;;  %v4442_v62 = vunpack.c.l.bf16 %v3611_v46 }
  0xc4   : > { %502 = vadd.xlane.f32.xlu0 %v4435_v56  ;;  %v4443_v56 = vunpack.c.h.bf16 %v3611_v46 }
  0xc5   : > { %504 = vadd.xlane.f32.xlu1 %v4437_v58  ;;  %v4446_v58 = vunpack.c.l.bf16 %v3620_v44 }
  0xc8   : > { %566 = vadd.xlane.f32.xlu0 %v4439_v59  ;;  %v3629_v59 = vld [vmem:[%s3346_s23 + $0x78] sm:$0xff]  }
  0xc9   : > { %568 = vadd.xlane.f32.xlu1 %v4440_v61  ;;  %v4449_v61 = vunpack.c.l.bf16 %v3629_v59  ;;  %v4450_v41 = vunpack.c.h.bf16 %v3629_v59 }
  0xcc   : > { %506 = vadd.xlane.f32.xlu0 %v4442_v62  ;;  %v3638_v62 = vld [vmem:[%s3346_s23 + $0xf8] sm:$0xff]  }
  0xcd   : > { %508 = vadd.xlane.f32.xlu1 %v4443_v56  ;;  %v4454_v56 = vunpack.c.l.bf16 %v3638_v62  ;;  %v4456_v40 = vunpack.c.h.bf16 %v3638_v62 }
  0xd0   : > { %570 = vadd.xlane.f32.xlu0 %v4446_v58 }
  0xd1   : > { %572 = vadd.xlane.f32.xlu1 %v4445_v43 }
  0xd4   : > { %510 = vadd.xlane.f32.xlu0 %v4449_v61 }
  0xd5   : > { %512 = vadd.xlane.f32.xlu1 %v4450_v41 }
  0xd8   : > { %574 = vadd.xlane.f32.xlu0 %v4454_v56 }
  0xd9   : > { %576 = vadd.xlane.f32.xlu1 %v4456_v40 }
  0xe5   : > { %v451_v43 = vpop.xlane.xlu0 %450 }
  0xe6   : > { %v515_v58 = vpop.xlane.xlu1 %514  ;;  %v579_v38 = vmul.f32 0.0078125, %v451_v43 }
  0xe7   : > { %v611_v37 = vmul.f32 0.0078125, %v515_v58 }
  0xe8   : > { %v3652_v61 = vsub.f32 %v2293_v2, %v579_v38 }
  0xe9   : > { %v3656_v41 = vsub.f32 %v2357_v3, %v611_v37  ;;  %v453_v35 = vpop.xlane.xlu0 %452 }
  0xea   : > { %v517_v34 = vpop.xlane.xlu1 %516  ;;  %v580_v32 = vmul.f32 0.0078125, %v453_v35  ;;  %v707_v56 = vmul.f32 %v3652_v61, %v3652_v61 }
  0xeb   : > { %v612_v31 = vmul.f32 0.0078125, %v517_v34  ;;  %v739_v43 = vmul.f32 %v3656_v41, %v3656_v41 }
  0xec   : > { %771 = vadd.xlane.f32.xlu0 %v707_v56  ;;  %v3664_v58 = vsub.f32 %v2294_v4, %v580_v32 }
  0xed   : > { %v3668_v2 = vsub.f32 %v2358_v5, %v612_v31  ;;  %v455_v3 = vpop.xlane.xlu0 %454 }
  0xee   : > { %v457_v37 = vpop.xlane.xlu1 %456  ;;  %v581_v38 = vmul.f32 0.0078125, %v455_v3  ;;  %v708_v35 = vmul.f32 %v3664_v58, %v3664_v58 }
  0xef   : > { %v582_v40 = vmul.f32 0.0078125, %v457_v37  ;;  %v740_v34 = vmul.f32 %v3668_v2, %v3668_v2 }
  0xf0   : > { %835 = vadd.xlane.f32.xlu0 %v739_v43  ;;  %773 = vadd.xlane.f32.xlu1 %v708_v35  ;;  %v3676_v0 = vsub.f32 %v2297_v7, %v581_v38 }
  0xf1   : > { %v3680_v1 = vsub.f32 %v2298_v8, %v582_v40  ;;  %v519_v4 = vpop.xlane.xlu0 %518 }
  0xf2   : > { %v521_v5 = vpop.xlane.xlu1 %520  ;;  %v613_v31 = vmul.f32 0.0078125, %v519_v4  ;;  %v709_v32 = vmul.f32 %v3676_v0, %v3676_v0 }
  0xf3   : > { %v614_v56 = vmul.f32 0.0078125, %v521_v5  ;;  %v710_v43 = vmul.f32 %v3680_v1, %v3680_v1 }
  0xf4   : > { %837 = vadd.xlane.f32.xlu1 %v740_v34  ;;  %775 = vadd.xlane.f32.xlu0 %v709_v32  ;;  %v3688_v7 = vsub.f32 %v2361_v11, %v613_v31  ;;  %v2859_v32 = vld [vmem:[#allocation7 + $0x38] sm:$0xff]  }
  0xf5   : > { %v3692_v6 = vsub.f32 %v2362_v12, %v614_v56  ;;  %v459_v8 = vpop.xlane.xlu0 %458  ;;  %2681 = vmatprep.subr.bf16.mxu0 %v2859_v32  ;;  %2761 = vmatprep.subr.bf16.mxu1 %v2859_v32 }
  0xf6   : > { %v461_v40 = vpop.xlane.xlu1 %460  ;;  %v583_v3 = vmul.f32 0.0078125, %v459_v8  ;;  %v741_v37 = vmul.f32 %v3688_v7, %v3688_v7  ;;  %2682 = vmatpush3.bf16.msra.mxu0 %v2859_v32  ;;  %2769 = vmatpush3.bf16.msra.mxu1 %v2859_v32 }
  0xf7   : > { %v584_v38 = vmul.f32 0.0078125, %v461_v40  ;;  %v742_v35 = vmul.f32 %v3692_v6, %v3692_v6 }
  0xf8   : > { %777 = vadd.xlane.f32.xlu1 %v710_v43  ;;  %839 = vadd.xlane.f32.xlu0 %v741_v37  ;;  %v3700_v11 = vsub.f32 %v2301_v13, %v583_v3  ;;  %v2860_v37 = vld [vmem:[#allocation7 + $0x30] sm:$0xff]  }
  0xf9   : > { %v3704_v9 = vsub.f32 %v2302_v14, %v584_v38  ;;  %v523_v12 = vpop.xlane.xlu0 %522  ;;  %2683 = vmatprep.subr.bf16.mxu0 %v2860_v37  ;;  %2762 = vmatprep.subr.bf16.mxu1 %v2860_v37 }
  0xfa   : > { %v525_v34 = vpop.xlane.xlu1 %524  ;;  %v615_v4 = vmul.f32 0.0078125, %v523_v12  ;;  %v711_v5 = vmul.f32 %v3700_v11, %v3700_v11  ;;  %2684 = vmatpush3.bf16.msra.mxu0 %v2860_v37  ;;  %2770 = vmatpush3.bf16.msra.mxu1 %v2860_v37 }
  0xfb   : > { %v616_v31 = vmul.f32 0.0078125, %v525_v34  ;;  %v712_v56 = vmul.f32 %v3704_v9, %v3704_v9 }
  0xfc   : > { %841 = vadd.xlane.f32.xlu1 %v742_v35  ;;  %779 = vadd.xlane.f32.xlu0 %v711_v5  ;;  %v3712_v13 = vsub.f32 %v2365_v16, %v615_v4  ;;  %v2861_v5 = vld [vmem:[#allocation7 + $0x28] sm:$0xff]  }
  0xfd   : > { %v3716_v10 = vsub.f32 %v2366_v17, %v616_v31  ;;  %v463_v14 = vpop.xlane.xlu0 %462  ;;  %2685 = vmatprep.subr.bf16.mxu0 %v2861_v5  ;;  %2763 = vmatprep.subr.bf16.mxu1 %v2861_v5 }
  0xfe   : > { %v465_v43 = vpop.xlane.xlu1 %464  ;;  %v585_v8 = vmul.f32 0.0078125, %v463_v14  ;;  %v743_v40 = vmul.f32 %v3712_v13, %v3712_v13  ;;  %2686 = vmatpush3.bf16.msra.mxu0 %v2861_v5  ;;  %2771 = vmatpush3.bf16.msra.mxu1 %v2861_v5 }
  0xff   : > { %v586_v3 = vmul.f32 0.0078125, %v465_v43  ;;  %v744_v16 = vmul.f32 %v3716_v10, %v3716_v10 }
 0x100   : > { %781 = vadd.xlane.f32.xlu1 %v712_v56  ;;  %843 = vadd.xlane.f32.xlu0 %v743_v40  ;;  %v3724_v15 = vsub.f32 %v2305_v19, %v585_v8  ;;  %v2862_v8 = vld [vmem:[#allocation7 + $0x20] sm:$0xff]  }
 0x101   : > { %v3728_v17 = vsub.f32 %v2306_v20, %v586_v3  ;;  %v527_v38 = vpop.xlane.xlu0 %526  ;;  %2687 = vmatprep.subr.bf16.mxu0 %v2862_v8  ;;  %2764 = vmatprep.subr.bf16.mxu1 %v2862_v8 }
 0x102   : > { %v529_v35 = vpop.xlane.xlu1 %528  ;;  %v617_v12 = vmul.f32 0.0078125, %v527_v38  ;;  %v713_v34 = vmul.f32 %v3724_v15, %v3724_v15  ;;  %2688 = vmatpush3.bf16.msra.mxu0 %v2862_v8  ;;  %2772 = vmatpush3.bf16.msra.mxu1 %v2862_v8 }
 0x103   : > { %v618_v4 = vmul.f32 0.0078125, %v529_v35  ;;  %v714_v19 = vmul.f32 %v3728_v17, %v3728_v17  ;;  %v2863_v35 = vld [vmem:[#allocation7 + $0x18] sm:$0xff]  }
 0x104   : > { %845 = vadd.xlane.f32.xlu1 %v744_v16  ;;  %783 = vadd.xlane.f32.xlu0 %v713_v34  ;;  %v3736_v18 = vsub.f32 %v2369_v22, %v617_v12 }
 0x105   : > { %v3740_v20 = vsub.f32 %v2370_v23, %v618_v4  ;;  %v467_v31 = vpop.xlane.xlu0 %466  ;;  %2689 = vmatprep.subr.bf16.mxu0 %v2863_v35  ;;  %2765 = vmatprep.subr.bf16.mxu1 %v2863_v35 }
 0x106   : > { %v469_v32 = vpop.xlane.xlu1 %468  ;;  %v587_v56 = vmul.f32 0.0078125, %v467_v31  ;;  %v745_v14 = vmul.f32 %v3736_v18, %v3736_v18  ;;  %2690 = vmatpush3.bf16.msra.mxu0 %v2863_v35  ;;  %2773 = vmatpush3.bf16.msra.mxu1 %v2863_v35  ;;  %v2864_v31 = vld [vmem:[#allocation7 + $0x10] sm:$0xff]  }
 0x107   : > { %v588_v43 = vmul.f32 0.0078125, %v469_v32  ;;  %v746_v22 = vmul.f32 %v3740_v20, %v3740_v20  ;;  %v4501_v32 = vunpack.c.h.bf16 %v3449_v30  ;;  %2691 = vmatprep.subr.bf16.mxu0 %v2864_v31  ;;  %2766 = vmatprep.subr.bf16.mxu1 %v2864_v31  ;;  %v4502_v30 = vunpack.c.l.bf16 %v3458_v33 }
 0x108   : > { %785 = vadd.xlane.f32.xlu1 %v714_v19  ;;  %847 = vadd.xlane.f32.xlu0 %v745_v14  ;;  %v3748_v21 = vsub.f32 %v2309_v25, %v587_v56 }
 0x109   : > { %v3752_v23 = vsub.f32 %v2310_v26, %v588_v43  ;;  %v531_v40 = vpop.xlane.xlu0 %530 }
 0x10a   : > { %v533_v3 = vpop.xlane.xlu1 %532  ;;  %v619_v37 = vmul.f32 0.0078125, %v531_v40  ;;  %v715_v16 = vmul.f32 %v3748_v21, %v3748_v21  ;;  %2692 = vmatpush3.bf16.msra.mxu0 %v2864_v31  ;;  %2774 = vmatpush3.bf16.msra.mxu1 %v2864_v31 }
 0x10b   : > { %v620_v38 = vmul.f32 0.0078125, %v533_v3  ;;  %v716_v25 = vmul.f32 %v3752_v23, %v3752_v23  ;;  %v2865_v3 = vld [vmem:[#allocation7 + $0x8] sm:$0xff]  }
 0x10c   : > { %849 = vadd.xlane.f32.xlu1 %v746_v22  ;;  %787 = vadd.xlane.f32.xlu0 %v715_v16  ;;  %v3760_v24 = vsub.f32 %v2373_v28, %v619_v37 }
 0x10d   : > { %v3764_v26 = vsub.f32 %v2374_v29, %v620_v38  ;;  %v471_v12 = vpop.xlane.xlu0 %470  ;;  %v4503_v38 = vunpack.c.h.bf16 %v3458_v33  ;;  %2693 = vmatprep.subr.bf16.mxu0 %v2865_v3  ;;  %2767 = vmatprep.subr.bf16.mxu1 %v2865_v3  ;;  %v4504_v33 = vunpack.c.l.bf16 %v3467_v36 }
 0x10e   : > { %v473_v34 = vpop.xlane.xlu1 %472  ;;  %v589_v4 = vmul.f32 0.0078125, %v471_v12  ;;  %v747_v5 = vmul.f32 %v3760_v24, %v3760_v24  ;;  %2694 = vmatpush3.bf16.msra.mxu0 %v2865_v3  ;;  %2775 = vmatpush3.bf16.msra.mxu1 %v2865_v3 }
 0x10f   : > { %v590_v19 = vmul.f32 0.0078125, %v473_v34  ;;  %v748_v28 = vmul.f32 %v3764_v26, %v3764_v26 }
 0x110   : > { %789 = vadd.xlane.f32.xlu1 %v716_v25  ;;  %851 = vadd.xlane.f32.xlu0 %v747_v5  ;;  %v3772_v29 = vsub.f32 %v4500_v27, %v589_v4  ;;  %v4505_v27 = vunpack.c.h.bf16 %v3467_v36  ;;  %v4506_v36 = vunpack.c.l.bf16 %v3476_v39 }
 0x111   : > { %v3776_v56 = vsub.f32 %v4501_v32, %v590_v19  ;;  %v535_v14 = vpop.xlane.xlu0 %534  ;;  %v2866_v19 = vld [vmem:[#allocation7] sm:$0xff]  }
 0x112   : > { %v537_v43 = vpop.xlane.xlu1 %536  ;;  %v621_v8 = vmul.f32 0.0078125, %v535_v14  ;;  %v717_v22 = vmul.f32 %v3772_v29, %v3772_v29  ;;  %2695 = vmatprep.subr.bf16.mxu0 %v2866_v19  ;;  %2768 = vmatprep.subr.bf16.mxu1 %v2866_v19 }
 0x113   : > { %v622_v40 = vmul.f32 0.0078125, %v537_v43  ;;  %v718_v37 = vmul.f32 %v3776_v56, %v3776_v56  ;;  %2696 = vmatpush3.bf16.msra.mxu0 %v2866_v19  ;;  %2776 = vmatpush3.bf16.msra.mxu1 %v2866_v19 }
 0x114   : > { %853 = vadd.xlane.f32.xlu1 %v748_v28  ;;  %791 = vadd.xlane.f32.xlu0 %v717_v22  ;;  %v3784_v16 = vsub.f32 %v4502_v30, %v621_v8  ;;  %v4507_v30 = vunpack.c.h.bf16 %v3476_v39  ;;  %v4509_v39 = vunpack.c.h.bf16 %v3485_v42 }
 0x115   : > { %v3788_v35 = vsub.f32 %v4503_v38, %v622_v40  ;;  %v475_v25 = vpop.xlane.xlu0 %474 }
 0x116   : > { %v477_v12 = vpop.xlane.xlu1 %476  ;;  %v591_v34 = vmul.f32 0.0078125, %v475_v25  ;;  %v749_v4 = vmul.f32 %v3784_v16, %v3784_v16 }
 0x117   : > { %v592_v5 = vmul.f32 0.0078125, %v477_v12  ;;  %v750_v31 = vmul.f32 %v3788_v35, %v3788_v35 }
 0x118   : > { %793 = vadd.xlane.f32.xlu1 %v718_v37  ;;  %855 = vadd.xlane.f32.xlu0 %v749_v4  ;;  %v3796_v28 = vsub.f32 %v4504_v33, %v591_v34 }
 0x119   : > { %v3800_v32 = vsub.f32 %v4505_v27, %v592_v5  ;;  %v539_v14 = vpop.xlane.xlu0 %538 }
 0x11a   : > { %v541_v43 = vpop.xlane.xlu1 %540  ;;  %v623_v8 = vmul.f32 0.0078125, %v539_v14  ;;  %v719_v22 = vmul.f32 %v3796_v28, %v3796_v28 }
 0x11b   : > { %v624_v40 = vmul.f32 0.0078125, %v541_v43  ;;  %v720_v3 = vmul.f32 %v3800_v32, %v3800_v32 }
 0x11c   : > { %857 = vadd.xlane.f32.xlu1 %v750_v31  ;;  %795 = vadd.xlane.f32.xlu0 %v719_v22  ;;  %v3808_v37 = vsub.f32 %v4506_v36, %v623_v8  ;;  %v4508_v31 = vunpack.c.l.bf16 %v3485_v42 }
 0x11d   : > { %v3812_v38 = vsub.f32 %v4507_v30, %v624_v40  ;;  %v479_v25 = vpop.xlane.xlu0 %478  ;;  %v4511_v30 = vunpack.c.h.bf16 %v3494_v45 }
 0x11e   : > { %v481_v12 = vpop.xlane.xlu1 %480  ;;  %v593_v34 = vmul.f32 0.0078125, %v479_v25  ;;  %v751_v4 = vmul.f32 %v3808_v37, %v3808_v37 }
 0x11f   : > { %v594_v5 = vmul.f32 0.0078125, %v481_v12  ;;  %v752_v19 = vmul.f32 %v3812_v38, %v3812_v38 }
 0x120   : > { %797 = vadd.xlane.f32.xlu1 %v720_v3  ;;  %859 = vadd.xlane.f32.xlu0 %v751_v4  ;;  %v3820_v33 = vsub.f32 %v4508_v31, %v593_v34  ;;  %v4510_v3 = vunpack.c.l.bf16 %v3494_v45  ;;  %v4513_v45 = vunpack.c.h.bf16 %v3503_v48 }
 0x121   : > { %v3824_v27 = vsub.f32 %v4509_v39, %v594_v5  ;;  %v543_v14 = vpop.xlane.xlu0 %542  ;;  %v4512_v39 = vunpack.c.l.bf16 %v3503_v48  ;;  %v4516_v48 = vunpack.c.h.bf16 %v3512_v51 }
 0x122   : > { %v545_v43 = vpop.xlane.xlu1 %544  ;;  %v625_v8 = vmul.f32 0.0078125, %v543_v14  ;;  %v721_v22 = vmul.f32 %v3820_v33, %v3820_v33 }
 0x123   : > { %v626_v40 = vmul.f32 0.0078125, %v545_v43  ;;  %v722_v42 = vmul.f32 %v3824_v27, %v3824_v27 }
 0x124   : > { %v3830_v36 = vsub.f32 %v4510_v3, %v625_v8  ;;  %861 = vadd.xlane.f32.xlu1 %v752_v19  ;;  %799 = vadd.xlane.f32.xlu0 %v721_v22 }
 0x125   : > { %v3834_v25 = vsub.f32 %v4511_v30, %v626_v40  ;;  %v483_v12 = vpop.xlane.xlu0 %482 }
 0x126   : > { %v485_v34 = vpop.xlane.xlu1 %484  ;;  %v595_v4 = vmul.f32 0.0078125, %v483_v12  ;;  %v753_v5 = vmul.f32 %v3830_v36, %v3830_v36  ;;  %v4514_v12 = vunpack.c.l.bf16 %v3512_v51  ;;  %v4519_v51 = vunpack.c.h.bf16 %v3521_v54 }
 0x127   : > { %v596_v31 = vmul.f32 0.0078125, %v485_v34  ;;  %v754_v43 = vmul.f32 %v3834_v25, %v3834_v25 }
 0x128   : > { %v3842_v14 = vsub.f32 %v4512_v39, %v595_v4  ;;  %801 = vadd.xlane.f32.xlu1 %v722_v42  ;;  %863 = vadd.xlane.f32.xlu0 %v753_v5 }
 0x129   : > { %v3846_v19 = vsub.f32 %v4513_v45, %v596_v31  ;;  %v547_v8 = vpop.xlane.xlu0 %546 }
 0x12a   : > { %v549_v22 = vpop.xlane.xlu1 %548  ;;  %v627_v40 = vmul.f32 0.0078125, %v547_v8  ;;  %v723_v3 = vmul.f32 %v3842_v14, %v3842_v14 }
 0x12b   : > { %v628_v30 = vmul.f32 0.0078125, %v549_v22  ;;  %v724_v4 = vmul.f32 %v3846_v19, %v3846_v19  ;;  %v4517_v22 = vunpack.c.l.bf16 %v3521_v54  ;;  %v4522_v54 = vunpack.c.h.bf16 %v3530_v57 }
 0x12c   : > { %v3854_v34 = vsub.f32 %v4514_v12, %v627_v40  ;;  %865 = vadd.xlane.f32.xlu1 %v754_v43  ;;  %803 = vadd.xlane.f32.xlu0 %v723_v3 }
 0x12d   : > { %v3858_v42 = vsub.f32 %v4516_v48, %v628_v30  ;;  %v487_v5 = vpop.xlane.xlu0 %486 }
 0x12e   : > { %4515 = vst [vmem:[#allocation18_spill] sm:$0xff] %v3854_v34  ;;  %v489_v31 = vpop.xlane.xlu1 %488  ;;  %v597_v39 = vmul.f32 0.0078125, %v487_v5  ;;  %v755_v45 = vmul.f32 %v3854_v34, %v3854_v34  ;;  %v4520_v34 = vunpack.c.l.bf16 %v3530_v57  ;;  %v4525_v57 = vunpack.c.h.bf16 %v3539_v60 }
 0x12f   : > { %v598_v8 = vmul.f32 0.0078125, %v489_v31  ;;  %v756_v3 = vmul.f32 %v3858_v42, %v3858_v42 }
 0x130   : > { %v3866_v40 = vsub.f32 %v4517_v22, %v597_v39  ;;  %805 = vadd.xlane.f32.xlu1 %v724_v4  ;;  %867 = vadd.xlane.f32.xlu0 %v755_v45 }
 0x131   : > { %v3870_v43 = vsub.f32 %v4519_v51, %v598_v8  ;;  %v551_v30 = vpop.xlane.xlu0 %550 }
 0x132   : > { %4518 = vst [vmem:[#allocation19_spill] sm:$0xff] %v3866_v40  ;;  %v553_v12 = vpop.xlane.xlu1 %552  ;;  %v629_v48 = vmul.f32 0.0078125, %v551_v30  ;;  %v725_v5 = vmul.f32 %v3866_v40, %v3866_v40  ;;  %v4523_v40 = vunpack.c.l.bf16 %v3539_v60  ;;  %v4528_v60 = vunpack.c.h.bf16 %v3548_v63 }
 0x133   : > { %v630_v31 = vmul.f32 0.0078125, %v553_v12  ;;  %v726_v45 = vmul.f32 %v3870_v43, %v3870_v43 }
 0x134   : > { %v3878_v39 = vsub.f32 %v4520_v34, %v629_v48  ;;  %869 = vadd.xlane.f32.xlu1 %v756_v3  ;;  %807 = vadd.xlane.f32.xlu0 %v725_v5 }
 0x135   : > { %v3882_v4 = vsub.f32 %v4522_v54, %v630_v31  ;;  %v491_v8 = vpop.xlane.xlu0 %490 }
 0x136   : > { %4521 = vst [vmem:[#allocation20_spill] sm:$0xff] %v3878_v39  ;;  %v493_v22 = vpop.xlane.xlu1 %492  ;;  %v599_v51 = vmul.f32 0.0078125, %v491_v8  ;;  %v757_v30 = vmul.f32 %v3878_v39, %v3878_v39  ;;  %v4526_v39 = vunpack.c.l.bf16 %v3548_v63  ;;  %v4531_v63 = vunpack.c.h.bf16 %v3557_v55 }
 0x137   : > { %v600_v12 = vmul.f32 0.0078125, %v493_v22  ;;  %v758_v48 = vmul.f32 %v3882_v4, %v3882_v4 }
 0x138   : > { %v3890_v34 = vsub.f32 %v4523_v40, %v599_v51  ;;  %809 = vadd.xlane.f32.xlu1 %v726_v45  ;;  %871 = vadd.xlane.f32.xlu0 %v757_v30 }
 0x139   : > { %v3894_v3 = vsub.f32 %v4525_v57, %v600_v12  ;;  %v555_v5 = vpop.xlane.xlu0 %554 }
 0x13a   : > { %4524 = vst [vmem:[#allocation21_spill] sm:$0xff] %v3890_v34  ;;  %v557_v31 = vpop.xlane.xlu1 %556  ;;  %v631_v54 = vmul.f32 0.0078125, %v555_v5  ;;  %v727_v8 = vmul.f32 %v3890_v34, %v3890_v34  ;;  %v4529_v34 = vunpack.c.l.bf16 %v3557_v55  ;;  %v4534_v55 = vunpack.c.h.bf16 %v3566_v53 }
 0x13b   : > { %v632_v22 = vmul.f32 0.0078125, %v557_v31  ;;  %v728_v51 = vmul.f32 %v3894_v3, %v3894_v3 }
 0x13c   : > { %v3902_v40 = vsub.f32 %v4526_v39, %v631_v54  ;;  %873 = vadd.xlane.f32.xlu1 %v758_v48  ;;  %811 = vadd.xlane.f32.xlu0 %v727_v8 }
 0x13d   : > { %v3906_v45 = vsub.f32 %v4528_v60, %v632_v22  ;;  %v495_v30 = vpop.xlane.xlu0 %494 }
 0x13e   : > { %4527 = vst [vmem:[#allocation22_spill] sm:$0xff] %v3902_v40  ;;  %v497_v12 = vpop.xlane.xlu1 %496  ;;  %v601_v57 = vmul.f32 0.0078125, %v495_v30  ;;  %v759_v5 = vmul.f32 %v3902_v40, %v3902_v40  ;;  %v4532_v40 = vunpack.c.l.bf16 %v3566_v53  ;;  %v4538_v53 = vunpack.c.h.bf16 %v3575_v52 }
 0x13f   : > { %v602_v31 = vmul.f32 0.0078125, %v497_v12  ;;  %v760_v54 = vmul.f32 %v3906_v45, %v3906_v45 }
 0x140   : > { %v3914_v39 = vsub.f32 %v4529_v34, %v601_v57  ;;  %813 = vadd.xlane.f32.xlu1 %v728_v51  ;;  %875 = vadd.xlane.f32.xlu0 %v759_v5 }
 0x141   : > { %v3918_v48 = vsub.f32 %v4531_v63, %v602_v31  ;;  %v559_v8 = vpop.xlane.xlu0 %558 }
 0x142   : > { %4530 = vst [vmem:[#allocation23_spill] sm:$0xff] %v3914_v39  ;;  %v561_v22 = vpop.xlane.xlu1 %560  ;;  %v633_v60 = vmul.f32 0.0078125, %v559_v8  ;;  %v729_v30 = vmul.f32 %v3914_v39, %v3914_v39  ;;  %v4536_v39 = vunpack.c.l.bf16 %v3575_v52  ;;  %v4542_v52 = vunpack.c.h.bf16 %v3584_v50 }
 0x143   : > { %v634_v12 = vmul.f32 0.0078125, %v561_v22  ;;  %v730_v57 = vmul.f32 %v3918_v48, %v3918_v48 }
 0x144   : > { %v3926_v34 = vsub.f32 %v4532_v40, %v633_v60  ;;  %877 = vadd.xlane.f32.xlu1 %v760_v54  ;;  %815 = vadd.xlane.f32.xlu0 %v729_v30 }
 0x145   : > { %v3930_v51 = vsub.f32 %v4534_v55, %v634_v12  ;;  %v499_v5 = vpop.xlane.xlu0 %498 }
 0x146   : > { %4533 = vst [vmem:[#allocation24_spill] sm:$0xff] %v3926_v34  ;;  %v501_v31 = vpop.xlane.xlu1 %500  ;;  %v603_v63 = vmul.f32 0.0078125, %v499_v5  ;;  %v761_v8 = vmul.f32 %v3926_v34, %v3926_v34  ;;  %v4540_v34 = vunpack.c.l.bf16 %v3584_v50  ;;  %v4546_v50 = vunpack.c.h.bf16 %v3593_v49 }
 0x147   : > { %4535 = vst [vmem:[#allocation25_spill] sm:$0xff] %v3930_v51  ;;  %v604_v22 = vmul.f32 0.0078125, %v501_v31  ;;  %v762_v60 = vmul.f32 %v3930_v51, %v3930_v51 }
 0x148   : > { %v3938_v40 = vsub.f32 %v4536_v39, %v603_v63  ;;  %817 = vadd.xlane.f32.xlu1 %v730_v57  ;;  %879 = vadd.xlane.f32.xlu0 %v761_v8 }
 0x149   : > { %v3942_v54 = vsub.f32 %v4538_v53, %v604_v22  ;;  %v563_v30 = vpop.xlane.xlu0 %562 }
 0x14a   : > { %4537 = vst [vmem:[#allocation26_spill] sm:$0xff] %v3938_v40  ;;  %v565_v12 = vpop.xlane.xlu1 %564  ;;  %v635_v55 = vmul.f32 0.0078125, %v563_v30  ;;  %v731_v5 = vmul.f32 %v3938_v40, %v3938_v40  ;;  %v4544_v40 = vunpack.c.l.bf16 %v3593_v49  ;;  %v4550_v49 = vunpack.c.h.bf16 %v3602_v47 }
 0x14b   : > { %4539 = vst [vmem:[#allocation27_spill] sm:$0xff] %v3942_v54  ;;  %v636_v31 = vmul.f32 0.0078125, %v565_v12  ;;  %v732_v63 = vmul.f32 %v3942_v54, %v3942_v54 }
 0x14c   : > { %v3950_v39 = vsub.f32 %v4540_v34, %v635_v55  ;;  %881 = vadd.xlane.f32.xlu1 %v762_v60  ;;  %819 = vadd.xlane.f32.xlu0 %v731_v5 }
 0x14d   : > { %v3954_v57 = vsub.f32 %v4542_v52, %v636_v31  ;;  %v503_v8 = vpop.xlane.xlu0 %502 }
 0x14e   : > { %4541 = vst [vmem:[#allocation28_spill] sm:$0xff] %v3950_v39  ;;  %v505_v22 = vpop.xlane.xlu1 %504  ;;  %v605_v53 = vmul.f32 0.0078125, %v503_v8  ;;  %v763_v30 = vmul.f32 %v3950_v39, %v3950_v39  ;;  %v4548_v39 = vunpack.c.l.bf16 %v3602_v47  ;;  %v4554_v47 = vunpack.c.h.bf16 %v3611_v46 }
 0x14f   : > { %4543 = vst [vmem:[#allocation29_spill] sm:$0xff] %v3954_v57  ;;  %v606_v12 = vmul.f32 0.0078125, %v505_v22  ;;  %v764_v55 = vmul.f32 %v3954_v57, %v3954_v57 }
 0x150   : > { %v3962_v34 = vsub.f32 %v4544_v40, %v605_v53  ;;  %821 = vadd.xlane.f32.xlu1 %v732_v63  ;;  %883 = vadd.xlane.f32.xlu0 %v763_v30 }
 0x151   : > { %v3966_v60 = vsub.f32 %v4546_v50, %v606_v12  ;;  %v567_v5 = vpop.xlane.xlu0 %566 }
 0x152   : > { %4545 = vst [vmem:[#allocation30_spill] sm:$0xff] %v3962_v34  ;;  %v569_v31 = vpop.xlane.xlu1 %568  ;;  %v637_v52 = vmul.f32 0.0078125, %v567_v5  ;;  %v733_v8 = vmul.f32 %v3962_v34, %v3962_v34  ;;  %v4552_v34 = vunpack.c.l.bf16 %v3611_v46  ;;  %v4558_v46 = vunpack.c.h.bf16 %v3620_v44 }
 0x153   : > { %4547 = vst [vmem:[#allocation31_spill] sm:$0xff] %v3966_v60  ;;  %v638_v22 = vmul.f32 0.0078125, %v569_v31  ;;  %v734_v53 = vmul.f32 %v3966_v60, %v3966_v60 }
 0x154   : > { %v3974_v40 = vsub.f32 %v4548_v39, %v637_v52  ;;  %885 = vadd.xlane.f32.xlu1 %v764_v55  ;;  %823 = vadd.xlane.f32.xlu0 %v733_v8 }
 0x155   : > { %v3978_v63 = vsub.f32 %v4550_v49, %v638_v22  ;;  %v507_v30 = vpop.xlane.xlu0 %506 }
 0x156   : > { %4549 = vst [vmem:[#allocation32_spill] sm:$0xff] %v3974_v40  ;;  %v509_v12 = vpop.xlane.xlu1 %508  ;;  %v607_v50 = vmul.f32 0.0078125, %v507_v30  ;;  %v765_v5 = vmul.f32 %v3974_v40, %v3974_v40  ;;  %v4556_v40 = vunpack.c.l.bf16 %v3620_v44  ;;  %v4562_v44 = vunpack.c.h.bf16 %v3629_v59 }
 0x157   : > { %4551 = vst [vmem:[#allocation33_spill] sm:$0xff] %v3978_v63  ;;  %v608_v31 = vmul.f32 0.0078125, %v509_v12  ;;  %v766_v52 = vmul.f32 %v3978_v63, %v3978_v63 }
 0x158   : > { %v3986_v39 = vsub.f32 %v4552_v34, %v607_v50  ;;  %825 = vadd.xlane.f32.xlu1 %v734_v53  ;;  %887 = vadd.xlane.f32.xlu0 %v765_v5 }
 0x159   : > { %v3990_v55 = vsub.f32 %v4554_v47, %v608_v31  ;;  %v571_v8 = vpop.xlane.xlu0 %570 }
 0x15a   : > { %4553 = vst [vmem:[#allocation34_spill] sm:$0xff] %v3986_v39  ;;  %v573_v22 = vpop.xlane.xlu1 %572  ;;  %v639_v49 = vmul.f32 0.0078125, %v571_v8  ;;  %v735_v30 = vmul.f32 %v3986_v39, %v3986_v39  ;;  %v4560_v39 = vunpack.c.l.bf16 %v3629_v59  ;;  %v4566_v59 = vunpack.c.h.bf16 %v3638_v62 }
 0x15b   : > { %4555 = vst [vmem:[#allocation35_spill] sm:$0xff] %v3990_v55  ;;  %v640_v12 = vmul.f32 0.0078125, %v573_v22  ;;  %v736_v50 = vmul.f32 %v3990_v55, %v3990_v55 }
 0x15c   : > { %v3998_v34 = vsub.f32 %v4556_v40, %v639_v49  ;;  %889 = vadd.xlane.f32.xlu1 %v766_v52  ;;  %827 = vadd.xlane.f32.xlu0 %v735_v30 }
 0x15d   : > { %v4002_v53 = vsub.f32 %v4558_v46, %v640_v12  ;;  %v511_v5 = vpop.xlane.xlu0 %510 }
 0x15e   : > { %4557 = vst [vmem:[#allocation36_spill] sm:$0xff] %v3998_v34  ;;  %v513_v31 = vpop.xlane.xlu1 %512  ;;  %v609_v47 = vmul.f32 0.0078125, %v511_v5  ;;  %v767_v8 = vmul.f32 %v3998_v34, %v3998_v34  ;;  %v4564_v34 = vunpack.c.l.bf16 %v3638_v62 }
 0x15f   : > { %4559 = vst [vmem:[#allocation37_spill] sm:$0xff] %v4002_v53  ;;  %v610_v22 = vmul.f32 0.0078125, %v513_v31  ;;  %v768_v49 = vmul.f32 %v4002_v53, %v4002_v53 }
 0x160   : > { %v4010_v40 = vsub.f32 %v4560_v39, %v609_v47  ;;  %829 = vadd.xlane.f32.xlu1 %v736_v50  ;;  %891 = vadd.xlane.f32.xlu0 %v767_v8 }
 0x161   : > { %v4014_v52 = vsub.f32 %v4562_v44, %v610_v22  ;;  %v575_v30 = vpop.xlane.xlu0 %574 }
 0x162   : > { %4561 = vst [vmem:[#allocation38_spill] sm:$0xff] %v4010_v40  ;;  %v577_v12 = vpop.xlane.xlu1 %576  ;;  %v641_v46 = vmul.f32 0.0078125, %v575_v30  ;;  %v737_v5 = vmul.f32 %v4010_v40, %v4010_v40 }
 0x163   : > { %4563 = vst [vmem:[#allocation39_spill] sm:$0xff] %v4014_v52  ;;  %v642_v31 = vmul.f32 0.0078125, %v577_v12  ;;  %v738_v47 = vmul.f32 %v4014_v52, %v4014_v52 }
 0x164   : > { %v4022_v39 = vsub.f32 %v4564_v34, %v641_v46  ;;  %893 = vadd.xlane.f32.xlu1 %v768_v49  ;;  %831 = vadd.xlane.f32.xlu0 %v737_v5  ;;  %v444_v34 = vlaneseq  ;;  %v440_v46 = vld [vmem:[%s274_s7] sm:$0x1] }
 0x165   : > { %v4026_v50 = vsub.f32 %v4566_v59, %v642_v31 }
 0x166   : > { %4565 = vst [vmem:[#allocation40_spill] sm:$0xff] %v4022_v39  ;;  %v769_v8 = vmul.f32 %v4022_v39, %v4022_v39  ;;  %v445_v44 = vshrl.u32 %v444_v34, 7 }
 0x167   : > { %4567 = vst [vmem:[#allocation41_spill] sm:$0xff] %v4026_v50  ;;  %v770_v22 = vmul.f32 %v4026_v50, %v4026_v50 }
 0x168   : > { %833 = vadd.xlane.f32.xlu1 %v738_v47  ;;  %895 = vadd.xlane.f32.xlu0 %v769_v8  ;;  %v4034_v12 = vsub.s32 0, %v445_v44 }
 0x16a   : > { %v447_v47 = vrot.slane %v440_v46, %v4034_v12 }
 0x16c   : > { %897 = vadd.xlane.f32.xlu1 %v770_v22  ;;  %v441_v22 = vld [vmem:[%s4402_s2] sm:$0x3] }
 0x16d   : > { %v449_v40 = vadd.f32 %v447_v47, %v441_v22 }
 0x175   : > { %v772_v49 = vpop.xlane.xlu0 %771 }
 0x176   : > { %v899_v30 = vmul.f32 0.0078125, %v772_v49 }
 0x178   : > { %v963_v62 = vadd.f32 1e-06, %v899_v30 }
 0x179   : > { %v774_v5 = vpop.xlane.xlu1 %773  ;;  %v836_v31 = vpop.xlane.xlu0 %835 }
 0x17a   : > { %2867 = vrsqrt.f32 %v963_v62  ;;  %v900_v59 = vmul.f32 0.0078125, %v774_v5  ;;  %v931_v39 = vmul.f32 0.0078125, %v836_v31 }
 0x17c   : > { %v964_v8 = vadd.f32 1e-06, %v900_v59  ;;  %v995_v52 = vadd.f32 1e-06, %v931_v39  ;;  %v1155_v39 = vadd.f32 1.0, %v449_v40  ;;  %v1158_v59 = vsub.s32 1, %v445_v44 }
 0x17d   : > { %v838_v34 = vpop.xlane.xlu1 %837  ;;  %v776_v49 = vpop.xlane.xlu0 %775 }
 0x17e   : > { %2869 = vrsqrt.f32 %v964_v8  ;;  %v932_v50 = vmul.f32 0.0078125, %v838_v34  ;;  %v901_v30 = vmul.f32 0.0078125, %v776_v49 }
 0x17f   : > { %2871 = vrsqrt.f32 %v995_v52  ;;  %v442_v52 = vadd.f32 %v441_v22, %v440_v46 }
 0x180   : > { %v996_v53 = vadd.f32 1e-06, %v932_v50  ;;  %v965_v55 = vadd.f32 1e-06, %v901_v30  ;;  %v4042_v50 = vrot.slane %v1155_v39, %v1158_v59 }
 0x181   : > { %v778_v62 = vpop.xlane.xlu1 %777  ;;  %v840_v5 = vpop.xlane.xlu0 %839 }
 0x182   : > { %2873 = vrsqrt.f32 %v996_v53  ;;  %v902_v31 = vmul.f32 0.0078125, %v778_v62  ;;  %v933_v63 = vmul.f32 0.0078125, %v840_v5 }
 0x183   : > { %2875 = vrsqrt.f32 %v965_v55 }
 0x184   : > { %v966_v60 = vadd.f32 1e-06, %v902_v31  ;;  %v997_v57 = vadd.f32 1e-06, %v933_v63 }
 0x185   : > { %v842_v54 = vpop.xlane.xlu1 %841  ;;  %v780_v51 = vpop.xlane.xlu0 %779 }
 0x186   : > { %2877 = vrsqrt.f32 %v966_v60  ;;  %v934_v8 = vmul.f32 0.0078125, %v842_v54  ;;  %v903_v34 = vmul.f32 0.0078125, %v780_v51  ;;  %v4047_v51 = vrot.slane %v442_v52, %v4034_v12 }
 0x187   : > { %v2868_v49 = vpop.eup %2867  ;;  %2879 = vrsqrt.f32 %v997_v57 }
 0x188   : > { %v998_v47 = vadd.f32 1e-06, %v934_v8  ;;  %v967_v30 = vadd.f32 1e-06, %v903_v34  ;;  %v1091_v53 = vmul.f32 %v2868_v49, %v3652_v61 }
 0x189   : > { %v782_v62 = vpop.xlane.xlu1 %781  ;;  %v844_v55 = vpop.xlane.xlu0 %843 }
 0x18a   : > { %2881 = vrsqrt.f32 %v998_v47  ;;  %v904_v40 = vmul.f32 0.0078125, %v782_v62  ;;  %v935_v44 = vmul.f32 0.0078125, %v844_v55  ;;  %v1160_v60 = vmul.f32 %v4042_v50, %v1091_v53 }
 0x18b   : > { %v2870_v63 = vpop.eup %2869  ;;  %2883 = vrsqrt.f32 %v967_v30 }
 0x18c   : > { %v2872_v54 = vpop.eup %2871  ;;  %v968_v57 = vadd.f32 1e-06, %v904_v40  ;;  %v999_v46 = vadd.f32 1e-06, %v935_v44  ;;  %v1092_v22 = vmul.f32 %v2870_v63, %v3664_v58  ;;  %v1228_v49 = vadd.f32 %v4047_v51, %v1160_v60 }
 0x18d   : > { %v846_v5 = vpop.xlane.xlu1 %845  ;;  %v784_v31 = vpop.xlane.xlu0 %783  ;;  %v1123_v61 = vmul.f32 %v2872_v54, %v3656_v41 }
 0x18e   : > { %2885 = vrsqrt.f32 %v968_v57  ;;  %v936_v39 = vmul.f32 0.0078125, %v846_v5  ;;  %v905_v59 = vmul.f32 0.0078125, %v784_v31  ;;  %v1161_v8 = vmul.f32 %v4042_v50, %v1092_v22 }
 0x18f   : > { %v2874_v34 = vpop.eup %2873  ;;  %2887 = vrsqrt.f32 %v999_v46  ;;  %v1192_v41 = vmul.f32 %v4042_v50, %v1123_v61 }
 0x190   : > { %v2876_v52 = vpop.eup %2875  ;;  %v1000_v47 = vadd.f32 1e-06, %v936_v39  ;;  %v969_v30 = vadd.f32 1e-06, %v905_v59  ;;  %v1229_v53 = vadd.f32 %v4047_v51, %v1161_v8  ;;  %v1124_v58 = vmul.f32 %v2874_v34, %v3668_v2 }
 0x191   : > { %v786_v62 = vpop.xlane.xlu1 %785  ;;  %v848_v55 = vpop.xlane.xlu0 %847  ;;  %v1093_v40 = vmul.f32 %v2876_v52, %v3676_v0  ;;  %v1260_v0 = vadd.f32 %v4047_v51, %v1192_v41 }
 0x192   : > { %2889 = vrsqrt.f32 %v1000_v47  ;;  %v906_v44 = vmul.f32 0.0078125, %v786_v62  ;;  %v937_v63 = vmul.f32 0.0078125, %v848_v55  ;;  %v1292_v54 = vpack.c.bf16 %v1229_v53, %v1228_v49 }
 0x193   : > { %v2878_v57 = vpop.eup %2877  ;;  %2891 = vrsqrt.f32 %v969_v30  ;;  %v1193_v60 = vmul.f32 %v4042_v50, %v1124_v58  ;;  %v1162_v46 = vmul.f32 %v4042_v50, %v1093_v40 }
 0x194   : > { %v2880_v22 = vpop.eup %2879  ;;  %v970_v5 = vadd.f32 1e-06, %v906_v44  ;;  %v1001_v31 = vadd.f32 1e-06, %v937_v63  ;;  %2697 = vmatprep.mubr.bf16.mxu0 %v1292_v54  ;;  %v1094_v2 = vmul.f32 %v2878_v57, %v3680_v1 }
 0x195   : > { %v850_v39 = vpop.xlane.xlu1 %849  ;;  %v788_v61 = vpop.xlane.xlu0 %787  ;;  %v1261_v59 = vadd.f32 %v4047_v51, %v1193_v60  ;;  %v1125_v8 = vmul.f32 %v2880_v22, %v3688_v7  ;;  %v1230_v53 = vadd.f32 %v4047_v51, %v1162_v46 }
 0x196   : > { %2893 = vrsqrt.f32 %v970_v5  ;;  %v938_v34 = vmul.f32 0.0078125, %v850_v39  ;;  %v907_v49 = vmul.f32 0.0078125, %v788_v61  ;;  %v1163_v52 = vmul.f32 %v4042_v50, %v1094_v2 }
 0x197   : > { %v2882_v47 = vpop.eup %2881  ;;  %2895 = vrsqrt.f32 %v1001_v31  ;;  %v1308_v30 = vpack.c.bf16 %v1261_v59, %v1260_v0  ;;  %v1194_v44 = vmul.f32 %v4042_v50, %v1125_v8 }
 0x198   : > { %v2884_v58 = vpop.eup %2883  ;;  %v1002_v1 = vadd.f32 1e-06, %v938_v34  ;;  %v971_v62 = vadd.f32 1e-06, %v907_v49  ;;  %v1231_v55 = vadd.f32 %v4047_v51, %v1163_v52  ;;  %v1126_v41 = vmul.f32 %v2882_v47, %v3692_v6 }
 0x199   : > { %2729 = vmatprep.mubr.bf16.mxu1 %v1308_v30  ;;  %v790_v40 = vpop.xlane.xlu1 %789  ;;  %v852_v7 = vpop.xlane.xlu0 %851  ;;  %v1095_v63 = vmul.f32 %v2884_v58, %v3700_v11  ;;  %v1262_v11 = vadd.f32 %v4047_v51, %v1194_v44 }
 0x19a   : > { %2897 = vrsqrt.f32 %v1002_v1  ;;  %v908_v54 = vmul.f32 0.0078125, %v790_v40  ;;  %v939_v57 = vmul.f32 0.0078125, %v852_v7  ;;  %v1293_v60 = vpack.c.bf16 %v1231_v55, %v1230_v53 }
 0x19b   : > { %v2886_v22 = vpop.eup %2885  ;;  %2899 = vrsqrt.f32 %v971_v62  ;;  %v1195_v46 = vmul.f32 %v4042_v50, %v1126_v41  ;;  %v1164_v5 = vmul.f32 %v4042_v50, %v1095_v63 }
 0x19c   : > { %v2888_v31 = vpop.eup %2887  ;;  %v972_v2 = vadd.f32 1e-06, %v908_v54  ;;  %v1003_v6 = vadd.f32 1e-06, %v939_v57  ;;  %2698 = vmatmul.mubr.bf16.vlgmr.msra.gmra.mxu0 %v1293_v60  ;;  %v1096_v39 = vmul.f32 %v2886_v22, %v3704_v9 }
 0x19d   : > { %v854_v61 = vpop.xlane.xlu1 %853  ;;  %v792_v0 = vpop.xlane.xlu0 %791  ;;  %v1263_v59 = vadd.f32 %v4047_v51, %v1195_v46  ;;  %v1127_v8 = vmul.f32 %v2888_v31, %v3712_v13  ;;  %v1232_v53 = vadd.f32 %v4047_v51, %v1164_v5 }
 0x19e   : > { %2901 = vrsqrt.f32 %v972_v2  ;;  %v940_v34 = vmul.f32 0.0078125, %v854_v61  ;;  %v909_v49 = vmul.f32 0.0078125, %v792_v0  ;;  %v1165_v52 = vmul.f32 %v4042_v50, %v1096_v39 }
 0x19f   : > { %v2890_v47 = vpop.eup %2889  ;;  %2903 = vrsqrt.f32 %v1003_v6  ;;  %v1309_v30 = vpack.c.bf16 %v1263_v59, %v1262_v11  ;;  %v1196_v40 = vmul.f32 %v4042_v50, %v1127_v8 }
 0x1a0   : > { %v2892_v58 = vpop.eup %2891  ;;  %v1004_v9 = vadd.f32 1e-06, %v940_v34  ;;  %v973_v1 = vadd.f32 1e-06, %v909_v49  ;;  %v1233_v62 = vadd.f32 %v4047_v51, %v1165_v52  ;;  %v1128_v55 = vmul.f32 %v2890_v47, %v3716_v10 }
 0x1a1   : > { %2730 = vmatmul.mubr.bf16.vlgmr.msra.gmra.mxu1 %v1309_v30  ;;  %v794_v41 = vpop.xlane.xlu1 %793  ;;  %v856_v13 = vpop.xlane.xlu0 %855  ;;  %v1097_v7 = vmul.f32 %v2892_v58, %v3724_v15  ;;  %v1264_v15 = vadd.f32 %v4047_v51, %v1196_v40 }
 0x1a2   : > { %2905 = vrsqrt.f32 %v1004_v9  ;;  %v910_v44 = vmul.f32 0.0078125, %v794_v41  ;;  %v941_v63 = vmul.f32 0.0078125, %v856_v13  ;;  %v1294_v54 = vpack.c.bf16 %v1233_v62, %v1232_v53 }
 0x1a3   : > { %v2894_v57 = vpop.eup %2893  ;;  %2907 = vrsqrt.f32 %v973_v1  ;;  %v1197_v60 = vmul.f32 %v4042_v50, %v1128_v55  ;;  %v1166_v22 = vmul.f32 %v4042_v50, %v1097_v7 }
 0x1a4   : > { %v2896_v46 = vpop.eup %2895  ;;  %v974_v5 = vadd.f32 1e-06, %v910_v44  ;;  %v1005_v10 = vadd.f32 1e-06, %v941_v63  ;;  %2701 = vmatprep.mubr.bf16.mxu0 %v1294_v54  ;;  %v1098_v31 = vmul.f32 %v2894_v57, %v3728_v17 }
 0x1a5   : > { %v858_v2 = vpop.xlane.xlu1 %857  ;;  %v796_v6 = vpop.xlane.xlu0 %795  ;;  %v1265_v39 = vadd.f32 %v4047_v51, %v1197_v60  ;;  %v1129_v61 = vmul.f32 %v2896_v46, %v3736_v18  ;;  %v1234_v49 = vadd.f32 %v4047_v51, %v1166_v22 }
 0x1a6   : > { %2909 = vrsqrt.f32 %v974_v5  ;;  %v942_v0 = vmul.f32 0.0078125, %v858_v2  ;;  %v911_v11 = vmul.f32 0.0078125, %v796_v6  ;;  %v1167_v59 = vmul.f32 %v4042_v50, %v1098_v31 }
 0x1a7   : > { %v2898_v8 = vpop.eup %2897  ;;  %2911 = vrsqrt.f32 %v1005_v10  ;;  %v1310_v34 = vpack.c.bf16 %v1265_v39, %v1264_v15  ;;  %v1198_v9 = vmul.f32 %v4042_v50, %v1129_v61 }
 0x1a8   : > { %v2900_v52 = vpop.eup %2899  ;;  %v1006_v17 = vadd.f32 1e-06, %v942_v0  ;;  %v975_v47 = vadd.f32 1e-06, %v911_v11  ;;  %v1235_v30 = vadd.f32 %v4047_v51, %v1167_v59  ;;  %v1130_v53 = vmul.f32 %v2898_v8, %v3740_v20 }
 0x1a9   : > { %2733 = vmatprep.mubr.bf16.mxu1 %v1310_v34  ;;  %v798_v58 = vpop.xlane.xlu1 %797  ;;  %v860_v18 = vpop.xlane.xlu0 %859  ;;  %v1099_v1 = vmul.f32 %v2900_v52, %v3748_v21  ;;  %v1266_v21 = vadd.f32 %v4047_v51, %v1198_v9 }
 0x1aa   : > { %2913 = vrsqrt.f32 %v1006_v17  ;;  %v912_v62 = vmul.f32 0.0078125, %v798_v58  ;;  %v943_v55 = vmul.f32 0.0078125, %v860_v18  ;;  %v1295_v41 = vpack.c.bf16 %v1235_v30, %v1234_v49 }
 0x1ab   : > { %v2902_v13 = vpop.eup %2901  ;;  %2915 = vrsqrt.f32 %v975_v47  ;;  %v1199_v40 = vmul.f32 %v4042_v50, %v1130_v53  ;;  %v1168_v7 = vmul.f32 %v4042_v50, %v1099_v1 }
 0x1ac   : > { %v2904_v44 = vpop.eup %2903  ;;  %v976_v63 = vadd.f32 1e-06, %v912_v62  ;;  %v1007_v20 = vadd.f32 1e-06, %v943_v55  ;;  %2702 = vmatmul.mubr.bf16.gmra.mxu0 %v1295_v41  ;;  %v1100_v54 = vmul.f32 %v2902_v13, %v3752_v23 }
 0x1ad   : > { %v862_v57 = vpop.xlane.xlu1 %861  ;;  %v800_v60 = vpop.xlane.xlu0 %799  ;;  %v1267_v22 = vadd.f32 %v4047_v51, %v1199_v40  ;;  %v1131_v46 = vmul.f32 %v2904_v44, %v3760_v24  ;;  %v1236_v15 = vadd.f32 %v4047_v51, %v1168_v7 }
 0x1ae   : > { %2917 = vrsqrt.f32 %v976_v63  ;;  %v944_v5 = vmul.f32 0.0078125, %v862_v57  ;;  %v913_v10 = vmul.f32 0.0078125, %v800_v60  ;;  %v1169_v31 = vmul.f32 %v4042_v50, %v1100_v54 }
 0x1af   : > { %v2906_v2 = vpop.eup %2905  ;;  %2919 = vrsqrt.f32 %v1007_v20  ;;  %v1311_v6 = vpack.c.bf16 %v1267_v22, %v1266_v21  ;;  %v1200_v8 = vmul.f32 %v4042_v50, %v1131_v46 }
 0x1b0   : > { %v2908_v39 = vpop.eup %2907  ;;  %v1008_v23 = vadd.f32 1e-06, %v944_v5  ;;  %v977_v61 = vadd.f32 1e-06, %v913_v10  ;;  %v1237_v0 = vadd.f32 %v4047_v51, %v1169_v31  ;;  %v1132_v11 = vmul.f32 %v2906_v2, %v3764_v26 }
 0x1b1   : > { %2734 = vmatmul.mubr.bf16.gmra.mxu1 %v1311_v6  ;;  %v802_v59 = vpop.xlane.xlu1 %801  ;;  %v864_v24 = vpop.xlane.xlu0 %863  ;;  %v1101_v34 = vmul.f32 %v2908_v39, %v3772_v29  ;;  %v1268_v29 = vadd.f32 %v4047_v51, %v1200_v8 }
 0x1b2   : > { %2921 = vrsqrt.f32 %v1008_v23  ;;  %v914_v49 = vmul.f32 0.0078125, %v802_v59  ;;  %v945_v52 = vmul.f32 0.0078125, %v864_v24  ;;  %v1296_v17 = vpack.c.bf16 %v1237_v0, %v1236_v15 }
 0x1b3   : > { %v2910_v47 = vpop.eup %2909  ;;  %2923 = vrsqrt.f32 %v977_v61  ;;  %v1201_v30 = vmul.f32 %v4042_v50, %v1132_v11  ;;  %v1170_v53 = vmul.f32 %v4042_v50, %v1101_v34 }
 0x1b4   : > { %v2912_v58 = vpop.eup %2911  ;;  %v978_v18 = vadd.f32 1e-06, %v914_v49  ;;  %v1009_v26 = vadd.f32 1e-06, %v945_v52  ;;  %2705 = vmatprep.mubr.bf16.mxu0 %v1296_v17  ;;  %v1102_v9 = vmul.f32 %v2910_v47, %v3776_v56 }
 0x1b5   : > { %v866_v1 = vpop.xlane.xlu1 %865  ;;  %v804_v62 = vpop.xlane.xlu0 %803  ;;  %v1269_v55 = vadd.f32 %v4047_v51, %v1201_v30  ;;  %v1133_v41 = vmul.f32 %v2912_v58, %v3784_v16  ;;  %v1238_v20 = vadd.f32 %v4047_v51, %v1170_v53 }
 0x1b6   : > { %2925 = vrsqrt.f32 %v978_v18  ;;  %v946_v13 = vmul.f32 0.0078125, %v866_v1  ;;  %v915_v40 = vmul.f32 0.0078125, %v804_v62  ;;  %v1171_v7 = vmul.f32 %v4042_v50, %v1102_v9 }
 0x1b7   : > { %v2914_v44 = vpop.eup %2913  ;;  %2927 = vrsqrt.f32 %v1009_v26  ;;  %v1312_v63 = vpack.c.bf16 %v1269_v55, %v1268_v29  ;;  %v1202_v46 = vmul.f32 %v4042_v50, %v1133_v41 }
 0x1b8   : > { %v2916_v54 = vpop.eup %2915  ;;  %v1010_v56 = vadd.f32 1e-06, %v946_v13  ;;  %v979_v57 = vadd.f32 1e-06, %v915_v40  ;;  %v1239_v60 = vadd.f32 %v4047_v51, %v1171_v7  ;;  %v1134_v21 = vmul.f32 %v2914_v44, %v3788_v35 }
 0x1b9   : > { %2737 = vmatprep.mubr.bf16.mxu1 %v1312_v63  ;;  %v806_v22 = vpop.xlane.xlu1 %805  ;;  %v868_v16 = vpop.xlane.xlu0 %867  ;;  %v1103_v5 = vmul.f32 %v2916_v54, %v3796_v28  ;;  %v1270_v28 = vadd.f32 %v4047_v51, %v1202_v46 }
 0x1ba   : > { %2929 = vrsqrt.f32 %v1010_v56  ;;  %v916_v10 = vmul.f32 0.0078125, %v806_v22  ;;  %v947_v31 = vmul.f32 0.0078125, %v868_v16  ;;  %v1297_v2 = vpack.c.bf16 %v1239_v60, %v1238_v20 }
 0x1bb   : > { %v2918_v6 = vpop.eup %2917  ;;  %2931 = vrsqrt.f32 %v979_v57  ;;  %v1203_v15 = vmul.f32 %v4042_v50, %v1134_v21  ;;  %v1172_v39 = vmul.f32 %v4042_v50, %v1103_v5 }
 0x1bc   : > { %v2920_v23 = vpop.eup %2919  ;;  %v980_v61 = vadd.f32 1e-06, %v916_v10  ;;  %v1011_v35 = vadd.f32 1e-06, %v947_v31  ;;  %2706 = vmatmul.mubr.bf16.gmra.mxu0 %v1297_v2  ;;  %v1104_v0 = vmul.f32 %v2918_v6, %v3800_v32 }
 0x1bd   : > { %v870_v11 = vpop.xlane.xlu1 %869  ;;  %v808_v59 = vpop.xlane.xlu0 %807  ;;  %v1271_v24 = vadd.f32 %v4047_v51, %v1203_v15  ;;  %v1135_v8 = vmul.f32 %v2920_v23, %v3808_v37  ;;  %v1240_v30 = vadd.f32 %v4047_v51, %v1172_v39 }
 0x1be   : > { %2933 = vrsqrt.f32 %v980_v61  ;;  %v948_v34 = vmul.f32 0.0078125, %v870_v11  ;;  %v917_v49 = vmul.f32 0.0078125, %v808_v59  ;;  %v1173_v52 = vmul.f32 %v4042_v50, %v1104_v0 }
 0x1bf   : > { %v2922_v17 = vpop.eup %2921  ;;  %2935 = vrsqrt.f32 %v1011_v35  ;;  %v1313_v47 = vpack.c.bf16 %v1271_v24, %v1270_v28  ;;  %v1204_v1 = vmul.f32 %v4042_v50, %v1135_v8 }
 0x1c0   : > { %v2924_v53 = vpop.eup %2923  ;;  %v1012_v32 = vadd.f32 1e-06, %v948_v34  ;;  %v981_v58 = vadd.f32 1e-06, %v917_v49  ;;  %v1241_v18 = vadd.f32 %v4047_v51, %v1173_v52  ;;  %v1136_v26 = vmul.f32 %v2922_v17, %v3812_v38 }
 0x1c1   : > { %2738 = vmatmul.mubr.bf16.gmra.mxu1 %v1313_v47  ;;  %v810_v9 = vpop.xlane.xlu1 %809  ;;  %v872_v37 = vpop.xlane.xlu0 %871  ;;  %v1105_v62 = vmul.f32 %v2924_v53, %v3820_v33  ;;  %v1272_v33 = vadd.f32 %v4047_v51, %v1204_v1 }
 0x1c2   : > { %2937 = vrsqrt.f32 %v1012_v32  ;;  %v918_v29 = vmul.f32 0.0078125, %v810_v9  ;;  %v949_v55 = vmul.f32 0.0078125, %v872_v37  ;;  %v1298_v41 = vpack.c.bf16 %v1241_v18, %v1240_v30  ;;  %v4568_v30 = vld [vmem:[#allocation18_spill] sm:$0xff] }
 0x1c3   : > { %v2926_v13 = vpop.eup %2925  ;;  %2939 = vrsqrt.f32 %v981_v58  ;;  %v1205_v40 = vmul.f32 %v4042_v50, %v1136_v26  ;;  %v1174_v7 = vmul.f32 %v4042_v50, %v1105_v62 }
 0x1c4   : > { %v2928_v44 = vpop.eup %2927  ;;  %v982_v63 = vadd.f32 1e-06, %v918_v29  ;;  %v1013_v38 = vadd.f32 1e-06, %v949_v55  ;;  %2709 = vmatprep.mubr.bf16.mxu0 %v1298_v41  ;;  %v1106_v20 = vmul.f32 %v2926_v13, %v3824_v27 }
 0x1c5   : > { %v874_v54 = vpop.xlane.xlu1 %873  ;;  %v812_v56 = vpop.xlane.xlu0 %811  ;;  %v1273_v57 = vadd.f32 %v4047_v51, %v1205_v40  ;;  %v1137_v60 = vmul.f32 %v2928_v44, %v3830_v36  ;;  %v1242_v10 = vadd.f32 %v4047_v51, %v1174_v7  ;;  %v4569_v7 = vld [vmem:[#allocation19_spill] sm:$0xff] }
 0x1c6   : > { %2941 = vrsqrt.f32 %v982_v63  ;;  %v950_v21 = vmul.f32 0.0078125, %v874_v54  ;;  %v919_v22 = vmul.f32 0.0078125, %v812_v56  ;;  %v1175_v16 = vmul.f32 %v4042_v50, %v1106_v20 }
 0x1c7   : > { %v2930_v46 = vpop.eup %2929  ;;  %2943 = vrsqrt.f32 %v1013_v38  ;;  %v1314_v5 = vpack.c.bf16 %v1273_v57, %v1272_v33  ;;  %v1206_v23 = vmul.f32 %v4042_v50, %v1137_v60 }
 0x1c8   : > { %v2932_v31 = vpop.eup %2931  ;;  %v1014_v27 = vadd.f32 1e-06, %v950_v21  ;;  %v983_v2 = vadd.f32 1e-06, %v919_v22  ;;  %v1243_v6 = vadd.f32 %v4047_v51, %v1175_v16  ;;  %v1138_v15 = vmul.f32 %v2930_v46, %v3834_v25 }
 0x1c9   : > { %2741 = vmatprep.mubr.bf16.mxu1 %v1314_v5  ;;  %v814_v39 = vpop.xlane.xlu1 %813  ;;  %v876_v36 = vpop.xlane.xlu0 %875  ;;  %v1107_v61 = vmul.f32 %v2932_v31, %v3842_v14  ;;  %v1274_v14 = vadd.f32 %v4047_v51, %v1206_v23 }
 0x1ca   : > { %2945 = vrsqrt.f32 %v1014_v27  ;;  %v920_v35 = vmul.f32 0.0078125, %v814_v39  ;;  %v951_v0 = vmul.f32 0.0078125, %v876_v36  ;;  %v1299_v11 = vpack.c.bf16 %v1243_v6, %v1242_v10  ;;  %v4570_v10 = vld [vmem:[#allocation20_spill] sm:$0xff] }
 0x1cb   : > { %v2934_v59 = vpop.eup %2933  ;;  %2947 = vrsqrt.f32 %v983_v2  ;;  %v1207_v28 = vmul.f32 %v4042_v50, %v1138_v15  ;;  %v1176_v24 = vmul.f32 %v4042_v50, %v1107_v61 }
 0x1cc   : > { %v2936_v8 = vpop.eup %2935  ;;  %v984_v34 = vadd.f32 1e-06, %v920_v35  ;;  %v1015_v25 = vadd.f32 1e-06, %v951_v0  ;;  %2710 = vmatmul.mubr.bf16.gmra.mxu0 %v1299_v11  ;;  %v1108_v49 = vmul.f32 %v2934_v59, %v3846_v19 }
 0x1cd   : > { %v878_v52 = vpop.xlane.xlu1 %877  ;;  %v816_v17 = vpop.xlane.xlu0 %815  ;;  %v1275_v47 = vadd.f32 %v4047_v51, %v1207_v28  ;;  %v1139_v53 = vmul.f32 %v2936_v8, %v4568_v30  ;;  %v1244_v37 = vadd.f32 %v4047_v51, %v1176_v24  ;;  %v4571_v24 = vld [vmem:[#allocation21_spill] sm:$0xff] }
 0x1ce   : > { %2949 = vrsqrt.f32 %v984_v34  ;;  %v952_v32 = vmul.f32 0.0078125, %v878_v52  ;;  %v921_v58 = vmul.f32 0.0078125, %v816_v17  ;;  %v1177_v18 = vmul.f32 %v4042_v50, %v1108_v49 }
 0x1cf   : > { %v2938_v26 = vpop.eup %2937  ;;  %2951 = vrsqrt.f32 %v1015_v25  ;;  %v1315_v9 = vpack.c.bf16 %v1275_v47, %v1274_v14  ;;  %v1208_v40 = vmul.f32 %v4042_v50, %v1139_v53 }
 0x1d0   : > { %v2940_v1 = vpop.eup %2939  ;;  %v1016_v19 = vadd.f32 1e-06, %v952_v32  ;;  %v985_v62 = vadd.f32 1e-06, %v921_v58  ;;  %v1245_v29 = vadd.f32 %v4047_v51, %v1177_v18  ;;  %v1140_v55 = vmul.f32 %v2938_v26, %v3858_v42 }
 0x1d1   : > { %2742 = vmatmul.mubr.bf16.gmra.mxu1 %v1315_v9  ;;  %v818_v41 = vpop.xlane.xlu1 %817  ;;  %v880_v13 = vpop.xlane.xlu0 %879  ;;  %v1109_v44 = vmul.f32 %v2940_v1, %v4569_v7  ;;  %v1276_v46 = vadd.f32 %v4047_v51, %v1208_v40  ;;  %v4572_v9 = vld [vmem:[#allocation22_spill] sm:$0xff] }
 0x1d2   : > { %2953 = vrsqrt.f32 %v1016_v19  ;;  %v922_v63 = vmul.f32 0.0078125, %v818_v41  ;;  %v953_v38 = vmul.f32 0.0078125, %v880_v13  ;;  %v1300_v20 = vpack.c.bf16 %v1245_v29, %v1244_v37 }
 0x1d3   : > { %v2942_v54 = vpop.eup %2941  ;;  %2955 = vrsqrt.f32 %v985_v62  ;;  %v1209_v56 = vmul.f32 %v4042_v50, %v1140_v55  ;;  %v1178_v33 = vmul.f32 %v4042_v50, %v1109_v44 }
 0x1d4   : > { %v2944_v57 = vpop.eup %2943  ;;  %v986_v60 = vadd.f32 1e-06, %v922_v63  ;;  %v1017_v42 = vadd.f32 1e-06, %v953_v38  ;;  %2713 = vmatprep.mubr.bf16.mxu0 %v1300_v20  ;;  %v1110_v21 = vmul.f32 %v2942_v54, %v3870_v43  ;;  %v4573_v54 = vld [vmem:[#allocation23_spill] sm:$0xff] }
 0x1d5   : > { %v882_v22 = vpop.xlane.xlu1 %881  ;;  %v820_v16 = vpop.xlane.xlu0 %819  ;;  %v1277_v5 = vadd.f32 %v4047_v51, %v1209_v56  ;;  %v1141_v31 = vmul.f32 %v2944_v57, %v4570_v10  ;;  %v1246_v36 = vadd.f32 %v4047_v51, %v1178_v33 }
 0x1d6   : > { %2957 = vrsqrt.f32 %v986_v60  ;;  %v954_v27 = vmul.f32 0.0078125, %v882_v22  ;;  %v923_v2 = vmul.f32 0.0078125, %v820_v16  ;;  %v1179_v6 = vmul.f32 %v4042_v50, %v1110_v21 }
 0x1d7   : > { %v2946_v15 = vpop.eup %2945  ;;  %2959 = vrsqrt.f32 %v1017_v42  ;;  %v1316_v39 = vpack.c.bf16 %v1277_v5, %v1276_v46  ;;  %v1210_v28 = vmul.f32 %v4042_v50, %v1141_v31 }
 0x1d8   : > { %v2948_v23 = vpop.eup %2947  ;;  %v1018_v43 = vadd.f32 1e-06, %v954_v27  ;;  %v987_v61 = vadd.f32 1e-06, %v923_v2  ;;  %v1247_v35 = vadd.f32 %v4047_v51, %v1179_v6  ;;  %v1142_v0 = vmul.f32 %v2946_v15, %v3882_v4  ;;  %v4574_v6 = vld [vmem:[#allocation24_spill] sm:$0xff] }
 0x1d9   : > { %2745 = vmatprep.mubr.bf16.mxu1 %v1316_v39  ;;  %v822_v11 = vpop.xlane.xlu1 %821  ;;  %v884_v59 = vpop.xlane.xlu0 %883  ;;  %v1111_v8 = vmul.f32 %v2948_v23, %v4571_v24  ;;  %v1278_v18 = vadd.f32 %v4047_v51, %v1210_v28  ;;  %v4575_v28 = vld [vmem:[#allocation25_spill] sm:$0xff] }
 0x1da   : > { %2961 = vrsqrt.f32 %v1018_v43  ;;  %v924_v34 = vmul.f32 0.0078125, %v822_v11  ;;  %v955_v25 = vmul.f32 0.0078125, %v884_v59  ;;  %v1301_v49 = vpack.c.bf16 %v1247_v35, %v1246_v36 }
 0x1db   : > { %v2950_v52 = vpop.eup %2949  ;;  %2963 = vrsqrt.f32 %v987_v61  ;;  %v1211_v17 = vmul.f32 %v4042_v50, %v1142_v0  ;;  %v1180_v14 = vmul.f32 %v4042_v50, %v1111_v8 }
 0x1dc   : > { %v2952_v47 = vpop.eup %2951  ;;  %v988_v30 = vadd.f32 1e-06, %v924_v34  ;;  %v1019_v4 = vadd.f32 1e-06, %v955_v25  ;;  %2714 = vmatmul.mubr.bf16.gmra.mxu0 %v1301_v49  ;;  %v1112_v53 = vmul.f32 %v2950_v52, %v3894_v3  ;;  %v4576_v49 = vld [vmem:[#allocation26_spill] sm:$0xff] }
 0x1dd   : > { %v886_v32 = vpop.xlane.xlu1 %885  ;;  %v824_v58 = vpop.xlane.xlu0 %823  ;;  %v1279_v26 = vadd.f32 %v4047_v51, %v1211_v17  ;;  %v1143_v37 = vmul.f32 %v2952_v47, %v4572_v9  ;;  %v1248_v41 = vadd.f32 %v4047_v51, %v1180_v14 }
 0x1de   : > { %2965 = vrsqrt.f32 %v988_v30  ;;  %v956_v1 = vmul.f32 0.0078125, %v886_v32  ;;  %v925_v19 = vmul.f32 0.0078125, %v824_v58  ;;  %v1181_v62 = vmul.f32 %v4042_v50, %v1112_v53 }
 0x1df   : > { %v2954_v29 = vpop.eup %2953  ;;  %2967 = vrsqrt.f32 %v1019_v4  ;;  %v1317_v55 = vpack.c.bf16 %v1279_v26, %v1278_v18  ;;  %v1212_v20 = vmul.f32 %v4042_v50, %v1143_v37  ;;  %v4577_v26 = vld [vmem:[#allocation27_spill] sm:$0xff] }
 0x1e0   : > { %v2956_v13 = vpop.eup %2955  ;;  %v1020_v3 = vadd.f32 1e-06, %v956_v1  ;;  %v989_v40 = vadd.f32 1e-06, %v925_v19  ;;  %v1249_v7 = vadd.f32 %v4047_v51, %v1181_v62  ;;  %v1144_v44 = vmul.f32 %v2954_v29, %v3906_v45  ;;  %v4578_v29 = vld [vmem:[#allocation28_spill] sm:$0xff] }
 0x1e1   : > { %2746 = vmatmul.mubr.bf16.gmra.mxu1 %v1317_v55  ;;  %v826_v63 = vpop.xlane.xlu1 %825  ;;  %v888_v38 = vpop.xlane.xlu0 %887  ;;  %v1113_v56 = vmul.f32 %v2956_v13, %v4573_v54  ;;  %v1280_v27 = vadd.f32 %v4047_v51, %v1212_v20 }
 0x1e2   : > { %2969 = vrsqrt.f32 %v1020_v3  ;;  %v926_v33 = vmul.f32 0.0078125, %v826_v63  ;;  %v957_v57 = vmul.f32 0.0078125, %v888_v38  ;;  %v1302_v60 = vpack.c.bf16 %v1249_v7, %v1248_v41 }
 0x1e3   : > { %v2958_v42 = vpop.eup %2957  ;;  %2971 = vrsqrt.f32 %v989_v40  ;;  %v1213_v21 = vmul.f32 %v4042_v50, %v1144_v44  ;;  %v1182_v22 = vmul.f32 %v4042_v50, %v1113_v56  ;;  %v4579_v56 = vld [vmem:[#allocation29_spill] sm:$0xff] }
 0x1e4   : > { %v2960_v16 = vpop.eup %2959  ;;  %v990_v46 = vadd.f32 1e-06, %v926_v33  ;;  %v1021_v45 = vadd.f32 1e-06, %v957_v57  ;;  %2717 = vmatprep.mubr.bf16.mxu0 %v1302_v60  ;;  %v1114_v5 = vmul.f32 %v2958_v42, %v3918_v48 }
 0x1e5   : > { %v890_v10 = vpop.xlane.xlu1 %889  ;;  %v828_v31 = vpop.xlane.xlu0 %827  ;;  %v1281_v2 = vadd.f32 %v4047_v51, %v1213_v21  ;;  %v1145_v15 = vmul.f32 %v2960_v16, %v4574_v6  ;;  %v1250_v35 = vadd.f32 %v4047_v51, %v1182_v22  ;;  %v4580_v21 = vld [vmem:[#allocation30_spill] sm:$0xff] }
 0x1e6   : > { %2973 = vrsqrt.f32 %v990_v46  ;;  %v958_v39 = vmul.f32 0.0078125, %v890_v10  ;;  %v927_v36 = vmul.f32 0.0078125, %v828_v31  ;;  %v1183_v23 = vmul.f32 %v4042_v50, %v1114_v5 }
 0x1e7   : > { %v2962_v43 = vpop.eup %2961  ;;  %2975 = vrsqrt.f32 %v1021_v45  ;;  %v1318_v61 = vpack.c.bf16 %v1281_v2, %v1280_v27  ;;  %v1214_v25 = vmul.f32 %v4042_v50, %v1145_v15  ;;  %v4581_v15 = vld [vmem:[#allocation31_spill] sm:$0xff] }
 0x1e8   : > { %v2964_v0 = vpop.eup %2963  ;;  %v1022_v48 = vadd.f32 1e-06, %v958_v39  ;;  %v991_v11 = vadd.f32 1e-06, %v927_v36  ;;  %v1251_v59 = vadd.f32 %v4047_v51, %v1183_v23  ;;  %v1146_v24 = vmul.f32 %v2962_v43, %v4575_v28 }
 0x1e9   : > { %2749 = vmatprep.mubr.bf16.mxu1 %v1318_v61  ;;  %v830_v8 = vpop.xlane.xlu1 %829  ;;  %v892_v34 = vpop.xlane.xlu0 %891  ;;  %v1115_v52 = vmul.f32 %v2964_v0, %v4576_v49  ;;  %v1282_v19 = vadd.f32 %v4047_v51, %v1214_v25  ;;  %v4582_v61 = vld [vmem:[#allocation32_spill] sm:$0xff]  ;;  %v4583_v25 = vld [vmem:[#allocation33_spill] sm:$0xff] }
 0x1ea   : > { %2977 = vrsqrt.f32 %v1022_v48  ;;  %v928_v17 = vmul.f32 0.0078125, %v830_v8  ;;  %v959_v14 = vmul.f32 0.0078125, %v892_v34  ;;  %v1303_v47 = vpack.c.bf16 %v1251_v59, %v1250_v35 }
 0x1eb   : > { %v2966_v30 = vpop.eup %2965  ;;  %2979 = vrsqrt.f32 %v991_v11  ;;  %v1215_v4 = vmul.f32 %v4042_v50, %v1146_v24  ;;  %v1184_v53 = vmul.f32 %v4042_v50, %v1115_v52 }
 0x1ec   : > { %v2968_v32 = vpop.eup %2967  ;;  %v992_v58 = vadd.f32 1e-06, %v928_v17  ;;  %v1023_v18 = vadd.f32 1e-06, %v959_v14  ;;  %2718 = vmatmul.mubr.bf16.gmra.mxu0 %v1303_v47  ;;  %v1116_v9 = vmul.f32 %v2966_v30, %v4577_v26  ;;  %v4584_v17 = vld [vmem:[#allocation34_spill] sm:$0xff] }
 0x1ed   : > { %v894_v37 = vpop.xlane.xlu1 %893  ;;  %v832_v1 = vpop.xlane.xlu0 %831  ;;  %v1283_v62 = vadd.f32 %v4047_v51, %v1215_v4  ;;  %v1147_v55 = vmul.f32 %v2968_v32, %v4578_v29  ;;  %v1252_v44 = vadd.f32 %v4047_v51, %v1184_v53 }
 0x1ee   : > { %2981 = vrsqrt.f32 %v992_v58  ;;  %v960_v41 = vmul.f32 0.0078125, %v894_v37  ;;  %v929_v13 = vmul.f32 0.0078125, %v832_v1  ;;  %v1185_v3 = vmul.f32 %v4042_v50, %v1116_v9  ;;  %v4586_v37 = vld [vmem:[#allocation36_spill] sm:$0xff] }
 0x1ef   : > { %v2970_v40 = vpop.eup %2969  ;;  %2983 = vrsqrt.f32 %v1023_v18  ;;  %v1319_v7 = vpack.c.bf16 %v1283_v62, %v1282_v19  ;;  %v1216_v42 = vmul.f32 %v4042_v50, %v1147_v55  ;;  %v4585_v18 = vld [vmem:[#allocation35_spill] sm:$0xff] }
 0x1f0   : > { %v2972_v63 = vpop.eup %2971  ;;  %v1024_v38 = vadd.f32 1e-06, %v960_v41  ;;  %v993_v20 = vadd.f32 1e-06, %v929_v13  ;;  %v1253_v54 = vadd.f32 %v4047_v51, %v1185_v3  ;;  %v1148_v33 = vmul.f32 %v2970_v40, %v4579_v56  ;;  %v4587_v3 = vld [vmem:[#allocation37_spill] sm:$0xff] }
 0x1f1   : > { %2750 = vmatmul.mubr.bf16.gmra.mxu1 %v1319_v7  ;;  %v834_v57 = vpop.xlane.xlu1 %833  ;;  %v896_v60 = vpop.xlane.xlu0 %895  ;;  %v1117_v22 = vmul.f32 %v2972_v63, %v4580_v21  ;;  %v1284_v23 = vadd.f32 %v4047_v51, %v1216_v42 }
 0x1f2   : > { %2985 = vrsqrt.f32 %v1024_v38  ;;  %v930_v16 = vmul.f32 0.0078125, %v834_v57  ;;  %v961_v46 = vmul.f32 0.0078125, %v896_v60  ;;  %v1304_v45 = vpack.c.bf16 %v1253_v54, %v1252_v44  ;;  %v4588_v44 = vld [vmem:[#allocation38_spill] sm:$0xff]  ;;  %v4589_v60 = vld [vmem:[#allocation39_spill] sm:$0xff] }
 0x1f3   : > { %v2974_v5 = vpop.eup %2973  ;;  %2987 = vrsqrt.f32 %v993_v20  ;;  %v1217_v10 = vmul.f32 %v4042_v50, %v1148_v33  ;;  %v1186_v31 = vmul.f32 %v4042_v50, %v1117_v22  ;;  %v4590_v22 = vld [vmem:[#allocation40_spill] sm:$0xff] }
 0x1f4   : > { %v2976_v27 = vpop.eup %2975  ;;  %v994_v2 = vadd.f32 1e-06, %v930_v16  ;;  %v1025_v6 = vadd.f32 1e-06, %v961_v46  ;;  %2721 = vmatprep.mubr.bf16.mxu0 %v1304_v45  ;;  %v1118_v39 = vmul.f32 %v2974_v5, %v4581_v15 }
 0x1f5   : > { %v898_v36 = vpop.xlane.xlu1 %897  ;;  %v1285_v43 = vadd.f32 %v4047_v51, %v1217_v10  ;;  %v1149_v35 = vmul.f32 %v2976_v27, %v4582_v61  ;;  %v1254_v28 = vadd.f32 %v4047_v51, %v1186_v31  ;;  %v4591_v27 = vld [vmem:[#allocation41_spill] sm:$0xff] }
 0x1f6   : > { %2989 = vrsqrt.f32 %v994_v2  ;;  %v962_v0 = vmul.f32 0.0078125, %v898_v36  ;;  %v1187_v48 = vmul.f32 %v4042_v50, %v1118_v39  ;;  %v1340_v61 = vld [vmem:[%s4404_s4] sm:$0x1] }
 0x1f7   : > { %v2978_v11 = vpop.eup %2977  ;;  %2991 = vrsqrt.f32 %v1025_v6  ;;  %v1320_v59 = vpack.c.bf16 %v1285_v43, %v1284_v23  ;;  %v1218_v52 = vmul.f32 %v4042_v50, %v1149_v35  ;;  %v1341_v35 = vunpack.c.l.bf16 %v1340_v61 }
 0x1f8   : > { %v2980_v24 = vpop.eup %2979  ;;  %v1026_v8 = vadd.f32 1e-06, %v962_v0  ;;  %v1255_v34 = vadd.f32 %v4047_v51, %v1187_v48  ;;  %v1150_v49 = vmul.f32 %v2978_v11, %v4583_v25 }
 0x1f9   : > { %2753 = vmatprep.mubr.bf16.mxu1 %v1320_v59  ;;  %v1119_v14 = vmul.f32 %v2980_v24, %v4584_v17  ;;  %v1286_v32 = vadd.f32 %v4047_v51, %v1218_v52  ;;  %v4243_v48 = vrot.slane %v1341_v35, %v4034_v12 }
 0x1fa   : > { %2993 = vrsqrt.f32 %v1026_v8  ;;  %v1305_v47 = vpack.c.bf16 %v1255_v34, %v1254_v28  ;;  %v1219_v30 = vmul.f32 %v4042_v50, %v1150_v49 }
 0x1fb   : > { %v2982_v4 = vpop.eup %2981  ;;  %v1188_v9 = vmul.f32 %v4042_v50, %v1119_v14 }
 0x1fc   : > { %v2984_v53 = vpop.eup %2983  ;;  %2722 = vmatmul.mubr.bf16.gmra.mxu0 %v1305_v47  ;;  %v1287_v58 = vadd.f32 %v4047_v51, %v1219_v30  ;;  %v1120_v26 = vmul.f32 %v2982_v4, %v4585_v18 }
 0x1fd   : > { %v1151_v1 = vmul.f32 %v2984_v53, %v4586_v37  ;;  %v1256_v41 = vadd.f32 %v4047_v51, %v1188_v9 }
 0x1fe   : > { %v1321_v19 = vpack.c.bf16 %v1287_v58, %v1286_v32  ;;  %v1189_v62 = vmul.f32 %v4042_v50, %v1120_v26 }
 0x1ff   : > { %v2986_v29 = vpop.eup %2985  ;;  %v1220_v7 = vmul.f32 %v4042_v50, %v1151_v1 }
 0x200   : > { %v2988_v55 = vpop.eup %2987  ;;  %2754 = vmatmul.mubr.bf16.gmra.mxu1 %v1321_v19  ;;  %v1257_v13 = vadd.f32 %v4047_v51, %v1189_v62  ;;  %v1152_v40 = vmul.f32 %v2986_v29, %v4587_v3 }
 0x201   : > { %v1121_v63 = vmul.f32 %v2988_v55, %v4588_v44  ;;  %v1288_v33 = vadd.f32 %v4047_v51, %v1220_v7 }
 0x202   : > { %v1306_v38 = vpack.c.bf16 %v1257_v13, %v1256_v41  ;;  %v1221_v20 = vmul.f32 %v4042_v50, %v1152_v40 }
 0x203   : > { %v2990_v54 = vpop.eup %2989  ;;  %v1190_v21 = vmul.f32 %v4042_v50, %v1121_v63 }
 0x204   : > { %v2992_v56 = vpop.eup %2991  ;;  %2725 = vmatprep.mubr.bf16.mxu0 %v1306_v38  ;;  %v1289_v57 = vadd.f32 %v4047_v51, %v1221_v20  ;;  %v1122_v42 = vmul.f32 %v2990_v54, %v4589_v60 }
 0x205   : > { %v1153_v16 = vmul.f32 %v2992_v56, %v4590_v22  ;;  %v1258_v10 = vadd.f32 %v4047_v51, %v1190_v21 }
 0x206   : > { %v1322_v46 = vpack.c.bf16 %v1289_v57, %v1288_v33  ;;  %v1191_v45 = vmul.f32 %v4042_v50, %v1122_v42 }
 0x207   : > { %v2994_v5 = vpop.eup %2993  ;;  %v1222_v6 = vmul.f32 %v4042_v50, %v1153_v16 }
 0x208   : > { %2757 = vmatprep.mubr.bf16.mxu1 %v1322_v46  ;;  %v1259_v31 = vadd.f32 %v4047_v51, %v1191_v45  ;;  %v1154_v2 = vmul.f32 %v2994_v5, %v4591_v27 }
 0x209   : > { %v1290_v36 = vadd.f32 %v4047_v51, %v1222_v6 }
 0x20a   : > { %v1307_v15 = vpack.c.bf16 %v1259_v31, %v1258_v10  ;;  %v1223_v39 = vmul.f32 %v4042_v50, %v1154_v2 }
 0x20c   : > { %2726 = vmatmul.mubr.bf16.gmra.mxu0 %v1307_v15  ;;  %v1291_v23 = vadd.f32 %v4047_v51, %v1223_v39 }
 0x20e   : > { %v1323_v43 = vpack.c.bf16 %v1291_v23, %v1290_v36 }
 0x210   : > { %2758 = vmatmul.mubr.bf16.gmra.mxu1 %v1323_v43 }
 0x25c   : > { %v2699_v0 = vpop.f32.mrf.mxu0 }
 0x25d   : > { %v1437_v50 = vadd.f32 %v2699_v0, %v4243_v48 }
 0x25e   : > { %v1428_v11 = vpop.f32.mrf.mxu0 }
 0x25f   : > { %v1429_v8 = vadd.f32 %v1428_v11, %v4243_v48 }
 0x260   : > { %v2700_v59 = vpop.f32.mrf.mxu0 }
 0x261   : > { %v1440_v28 = vadd.f32 %v2700_v59, %v4243_v48  ;;  %v2731_v24 = vpop.f32.mrf.mxu1 }
 0x262   : > { %v1431_v51 = vpop.f32.mrf.mxu0  ;;  %v1565_v17 = vadd.f32 %v2731_v24, %v4243_v48 }
 0x263   : > { %v2427_v34 = vpack.c.bf16 %v1440_v28, %v1437_v50  ;;  %v1432_v25 = vadd.f32 %v1431_v51, %v4243_v48  ;;  %v1556_v49 = vpop.f32.mrf.mxu1 }
 0x264   : > { %v1557_v30 = vadd.f32 %v1556_v49, %v4243_v48 }
 0x265   : > { %2610 = vst [vmem:[%s4251_s17 + $0x8] sm:$0xff] %v2427_v34   ;;  %v2422_v12 = vpack.c.bf16 %v1432_v25, %v1429_v8  ;;  %v2732_v52 = vpop.f32.mrf.mxu1 }
 0x266   : > { %v1568_v14 = vadd.f32 %v2732_v52, %v4243_v48 }
 0x267   : > { %2423 = vst [vmem:[%s4251_s17] sm:$0xff] %v2422_v12   ;;  %v1559_v47 = vpop.f32.mrf.mxu1 }
 0x268   : > { %v2507_v4 = vpack.c.bf16 %v1568_v14, %v1565_v17  ;;  %v1560_v53 = vadd.f32 %v1559_v47, %v4243_v48 }
 0x26a   : > { %2626 = vst [vmem:[%s4251_s17 + $0x88] sm:$0xff] %v2507_v4   ;;  %v2502_v32 = vpack.c.bf16 %v1560_v53, %v1557_v30 }
 0x26c   : > { %2625 = vst [vmem:[%s4251_s17 + $0x80] sm:$0xff] %v2502_v32   ;;  %v2703_v58 = vpop.f32.mrf.mxu0 }
 0x26d   : > { %v1453_v9 = vadd.f32 %v2703_v58, %v4243_v48 }
 0x26e   : > { %v1444_v18 = vpop.f32.mrf.mxu0 }
 0x26f   : > { %v1445_v62 = vadd.f32 %v1444_v18, %v4243_v48 }
 0x270   : > { %v2704_v26 = vpop.f32.mrf.mxu0 }
 0x271   : > { %v1456_v37 = vadd.f32 %v2704_v26, %v4243_v48  ;;  %v2735_v1 = vpop.f32.mrf.mxu1 }
 0x272   : > { %v1447_v19 = vpop.f32.mrf.mxu0  ;;  %v1581_v40 = vadd.f32 %v2735_v1, %v4243_v48 }
 0x273   : > { %v2437_v29 = vpack.c.bf16 %v1456_v37, %v1453_v9  ;;  %v1448_v55 = vadd.f32 %v1447_v19, %v4243_v48  ;;  %v1572_v41 = vpop.f32.mrf.mxu1 }
 0x274   : > { %v1573_v63 = vadd.f32 %v1572_v41, %v4243_v48 }
 0x275   : > { %2612 = vst [vmem:[%s4251_s17 + $0x18] sm:$0xff] %v2437_v29   ;;  %v2432_v13 = vpack.c.bf16 %v1448_v55, %v1445_v62  ;;  %v2736_v3 = vpop.f32.mrf.mxu1 }
 0x276   : > { %v1584_v7 = vadd.f32 %v2736_v3, %v4243_v48 }
 0x277   : > { %2611 = vst [vmem:[%s4251_s17 + $0x10] sm:$0xff] %v2432_v13   ;;  %v1575_v44 = vpop.f32.mrf.mxu1 }
 0x278   : > { %v2517_v38 = vpack.c.bf16 %v1584_v7, %v1581_v40  ;;  %v1576_v20 = vadd.f32 %v1575_v44, %v4243_v48 }
 0x27a   : > { %2628 = vst [vmem:[%s4251_s17 + $0x98] sm:$0xff] %v2517_v38   ;;  %v2512_v54 = vpack.c.bf16 %v1576_v20, %v1573_v63 }
 0x27c   : > { %2627 = vst [vmem:[%s4251_s17 + $0x90] sm:$0xff] %v2512_v54   ;;  %v2707_v56 = vpop.f32.mrf.mxu0 }
 0x27d   : > { %v1469_v60 = vadd.f32 %v2707_v56, %v4243_v48 }
 0x27e   : > { %v1460_v33 = vpop.f32.mrf.mxu0 }
 0x27f   : > { %v1461_v16 = vadd.f32 %v1460_v33, %v4243_v48 }
 0x280   : > { %v2708_v57 = vpop.f32.mrf.mxu0 }
 0x281   : > { %v1472_v42 = vadd.f32 %v2708_v57, %v4243_v48  ;;  %v2739_v21 = vpop.f32.mrf.mxu1 }
 0x282   : > { %v1463_v22 = vpop.f32.mrf.mxu0  ;;  %v1597_v27 = vadd.f32 %v2739_v21, %v4243_v48 }
 0x283   : > { %v2447_v46 = vpack.c.bf16 %v1472_v42, %v1469_v60  ;;  %v1464_v45 = vadd.f32 %v1463_v22, %v4243_v48  ;;  %v1588_v5 = vpop.f32.mrf.mxu1 }
 0x284   : > { %v1589_v15 = vadd.f32 %v1588_v5, %v4243_v48 }
 0x285   : > { %2614 = vst [vmem:[%s4251_s17 + $0x28] sm:$0xff] %v2447_v46   ;;  %v2442_v10 = vpack.c.bf16 %v1464_v45, %v1461_v16  ;;  %v2740_v31 = vpop.f32.mrf.mxu1 }
 0x286   : > { %v1600_v2 = vadd.f32 %v2740_v31, %v4243_v48 }
 0x287   : > { %2613 = vst [vmem:[%s4251_s17 + $0x20] sm:$0xff] %v2442_v10   ;;  %v1591_v6 = vpop.f32.mrf.mxu1 }
 0x288   : > { %v2527_v39 = vpack.c.bf16 %v1600_v2, %v1597_v27  ;;  %v1592_v36 = vadd.f32 %v1591_v6, %v4243_v48 }
 0x28a   : > { %2630 = vst [vmem:[%s4251_s17 + $0xa8] sm:$0xff] %v2527_v39   ;;  %v2522_v23 = vpack.c.bf16 %v1592_v36, %v1589_v15 }
 0x28c   : > { %2629 = vst [vmem:[%s4251_s17 + $0xa0] sm:$0xff] %v2522_v23   ;;  %v2711_v43 = vpop.f32.mrf.mxu0 }
 0x28d   : > { %v1485_v0 = vadd.f32 %v2711_v43, %v4243_v48 }
 0x28e   : > { %v1476_v61 = vpop.f32.mrf.mxu0 }
 0x28f   : > { %v1477_v28 = vadd.f32 %v1476_v61, %v4243_v48 }
 0x290   : > { %v2712_v35 = vpop.f32.mrf.mxu0 }
 0x291   : > { %v1488_v11 = vadd.f32 %v2712_v35, %v4243_v48  ;;  %v2743_v59 = vpop.f32.mrf.mxu1 }
 0x292   : > { %v1479_v50 = vpop.f32.mrf.mxu0  ;;  %v1613_v49 = vadd.f32 %v2743_v59, %v4243_v48 }
 0x293   : > { %v2457_v24 = vpack.c.bf16 %v1488_v11, %v1485_v0  ;;  %v1480_v51 = vadd.f32 %v1479_v50, %v4243_v48  ;;  %v1604_v8 = vpop.f32.mrf.mxu1 }
 0x294   : > { %v1605_v17 = vadd.f32 %v1604_v8, %v4243_v48 }
 0x295   : > { %2616 = vst [vmem:[%s4251_s17 + $0x38] sm:$0xff] %v2457_v24   ;;  %v2452_v34 = vpack.c.bf16 %v1480_v51, %v1477_v28  ;;  %v2744_v25 = vpop.f32.mrf.mxu1 }
 0x296   : > { %v1616_v12 = vadd.f32 %v2744_v25, %v4243_v48 }
 0x297   : > { %2615 = vst [vmem:[%s4251_s17 + $0x30] sm:$0xff] %v2452_v34   ;;  %v1607_v52 = vpop.f32.mrf.mxu1 }
 0x298   : > { %v2537_v14 = vpack.c.bf16 %v1616_v12, %v1613_v49  ;;  %v1608_v47 = vadd.f32 %v1607_v52, %v4243_v48 }
 0x29a   : > { %2632 = vst [vmem:[%s4251_s17 + $0xb8] sm:$0xff] %v2537_v14   ;;  %v2532_v30 = vpack.c.bf16 %v1608_v47, %v1605_v17 }
 0x29c   : > { %2631 = vst [vmem:[%s4251_s17 + $0xb0] sm:$0xff] %v2532_v30   ;;  %v2715_v4 = vpop.f32.mrf.mxu0 }
 0x29d   : > { %v1501_v58 = vadd.f32 %v2715_v4, %v4243_v48 }
 0x29e   : > { %v1492_v53 = vpop.f32.mrf.mxu0 }
 0x29f   : > { %v1493_v37 = vadd.f32 %v1492_v53, %v4243_v48 }
 0x2a0   : > { %v2716_v32 = vpop.f32.mrf.mxu0 }
 0x2a1   : > { %v1504_v18 = vadd.f32 %v2716_v32, %v4243_v48  ;;  %v2747_v26 = vpop.f32.mrf.mxu1 }
 0x2a2   : > { %v1495_v9 = vpop.f32.mrf.mxu0  ;;  %v1629_v41 = vadd.f32 %v2747_v26, %v4243_v48 }
 0x2a3   : > { %v2467_v1 = vpack.c.bf16 %v1504_v18, %v1501_v58  ;;  %v1496_v19 = vadd.f32 %v1495_v9, %v4243_v48  ;;  %v1620_v62 = vpop.f32.mrf.mxu1 }
 0x2a4   : > { %v1621_v40 = vadd.f32 %v1620_v62, %v4243_v48 }
 0x2a5   : > { %2618 = vst [vmem:[%s4251_s17 + $0x48] sm:$0xff] %v2467_v1   ;;  %v2462_v29 = vpack.c.bf16 %v1496_v19, %v1493_v37  ;;  %v2748_v55 = vpop.f32.mrf.mxu1 }
 0x2a6   : > { %v1632_v13 = vadd.f32 %v2748_v55, %v4243_v48 }
 0x2a7   : > { %2617 = vst [vmem:[%s4251_s17 + $0x40] sm:$0xff] %v2462_v29   ;;  %v1623_v3 = vpop.f32.mrf.mxu1 }
 0x2a8   : > { %v2547_v7 = vpack.c.bf16 %v1632_v13, %v1629_v41  ;;  %v1624_v44 = vadd.f32 %v1623_v3, %v4243_v48 }
 0x2aa   : > { %2634 = vst [vmem:[%s4251_s17 + $0xc8] sm:$0xff] %v2547_v7   ;;  %v2542_v63 = vpack.c.bf16 %v1624_v44, %v1621_v40 }
 0x2ac   : > { %2633 = vst [vmem:[%s4251_s17 + $0xc0] sm:$0xff] %v2542_v63   ;;  %v2719_v38 = vpop.f32.mrf.mxu0 }
 0x2ad   : > { %v1517_v56 = vadd.f32 %v2719_v38, %v4243_v48 }
 0x2ae   : > { %v1508_v20 = vpop.f32.mrf.mxu0 }
 0x2af   : > { %v1509_v42 = vadd.f32 %v1508_v20, %v4243_v48 }
 0x2b0   : > { %v2720_v54 = vpop.f32.mrf.mxu0 }
 0x2b1   : > { %v1520_v33 = vadd.f32 %v2720_v54, %v4243_v48  ;;  %v2751_v57 = vpop.f32.mrf.mxu1 }
 0x2b2   : > { %v1511_v60 = vpop.f32.mrf.mxu0  ;;  %v1645_v5 = vadd.f32 %v2751_v57, %v4243_v48 }
 0x2b3   : > { %v2477_v21 = vpack.c.bf16 %v1520_v33, %v1517_v56  ;;  %v1512_v22 = vadd.f32 %v1511_v60, %v4243_v48  ;;  %v1636_v16 = vpop.f32.mrf.mxu1 }
 0x2b4   : > { %v1637_v27 = vadd.f32 %v1636_v16, %v4243_v48 }
 0x2b5   : > { %2620 = vst [vmem:[%s4251_s17 + $0x58] sm:$0xff] %v2477_v21   ;;  %v2472_v46 = vpack.c.bf16 %v1512_v22, %v1509_v42  ;;  %v2752_v45 = vpop.f32.mrf.mxu1 }
 0x2b6   : > { %v1648_v10 = vadd.f32 %v2752_v45, %v4243_v48 }
 0x2b7   : > { %2619 = vst [vmem:[%s4251_s17 + $0x50] sm:$0xff] %v2472_v46   ;;  %v1639_v31 = vpop.f32.mrf.mxu1 }
 0x2b8   : > { %v2557_v2 = vpack.c.bf16 %v1648_v10, %v1645_v5  ;;  %v1640_v6 = vadd.f32 %v1639_v31, %v4243_v48 }
 0x2ba   : > { %2636 = vst [vmem:[%s4251_s17 + $0xd8] sm:$0xff] %v2557_v2   ;;  %v2552_v15 = vpack.c.bf16 %v1640_v6, %v1637_v27 }
 0x2bc   : > { %2635 = vst [vmem:[%s4251_s17 + $0xd0] sm:$0xff] %v2552_v15   ;;  %v2723_v39 = vpop.f32.mrf.mxu0 }
 0x2bd   : > { %v1533_v61 = vadd.f32 %v2723_v39, %v4243_v48 }
 0x2be   : > { %v1524_v36 = vpop.f32.mrf.mxu0 }
 0x2bf   : > { %v1525_v59 = vadd.f32 %v1524_v36, %v4243_v48 }
 0x2c0   : > { %v2724_v23 = vpop.f32.mrf.mxu0  ;;  %v2755_v43 = vpop.f32.mrf.mxu1 }
 0x2c1   : > { %v1536_v35 = vadd.f32 %v2724_v23, %v4243_v48  ;;  %v1661_v51 = vadd.f32 %v2755_v43, %v4243_v48 }
 0x2c2   : > { %v1527_v0 = vpop.f32.mrf.mxu0  ;;  %v1652_v11 = vpop.f32.mrf.mxu1 }
 0x2c3   : > { %v2487_v50 = vpack.c.bf16 %v1536_v35, %v1533_v61  ;;  %v1528_v28 = vadd.f32 %v1527_v0, %v4243_v48  ;;  %v1653_v49 = vadd.f32 %v1652_v11, %v4243_v48 }
 0x2c4   : > { %v2756_v24 = vpop.f32.mrf.mxu1 }
 0x2c5   : > { %2622 = vst [vmem:[%s4251_s17 + $0x68] sm:$0xff] %v2487_v50   ;;  %v2482_v8 = vpack.c.bf16 %v1528_v28, %v1525_v59  ;;  %v1664_v34 = vadd.f32 %v2756_v24, %v4243_v48 }
 0x2c6   : > { %v1655_v25 = vpop.f32.mrf.mxu1 }
 0x2c7   : > { %2621 = vst [vmem:[%s4251_s17 + $0x60] sm:$0xff] %v2482_v8   ;;  %v2567_v12 = vpack.c.bf16 %v1664_v34, %v1661_v51  ;;  %v1656_v52 = vadd.f32 %v1655_v25, %v4243_v48 }
 0x2c9   : > { %2638 = vst [vmem:[%s4251_s17 + $0xe8] sm:$0xff] %v2567_v12   ;;  %v2562_v17 = vpack.c.bf16 %v1656_v52, %v1653_v49 }
 0x2cb   : > { %2637 = vst [vmem:[%s4251_s17 + $0xe0] sm:$0xff] %v2562_v17  }
 0x2cc   : > { %v2727_v14 = vpop.f32.mrf.mxu0 }
 0x2cd   : > { %v1549_v53 = vadd.f32 %v2727_v14, %v4243_v48 }
 0x2ce   : > { %v1540_v47 = vpop.f32.mrf.mxu0 }
 0x2cf   : > { %v1541_v26 = vadd.f32 %v1540_v47, %v4243_v48 }
 0x2d0   : > { %v2728_v30 = vpop.f32.mrf.mxu0  ;;  %v2759_v4 = vpop.f32.mrf.mxu1 }
 0x2d1   : > { %v1552_v32 = vadd.f32 %v2728_v30, %v4243_v48  ;;  %v1677_v19 = vadd.f32 %v2759_v4, %v4243_v48 }
 0x2d2   : > { %v1543_v58 = vpop.f32.mrf.mxu0  ;;  %v1668_v18 = vpop.f32.mrf.mxu1 }
 0x2d3   : > { %v2497_v9 = vpack.c.bf16 %v1552_v32, %v1549_v53  ;;  %v1544_v37 = vadd.f32 %v1543_v58, %v4243_v48  ;;  %v1669_v41 = vadd.f32 %v1668_v18, %v4243_v48 }
 0x2d4   : > { %v2760_v1 = vpop.f32.mrf.mxu1 }
 0x2d5   : > { %2624 = vst [vmem:[%s4251_s17 + $0x78] sm:$0xff] %v2497_v9   ;;  %v2492_v62 = vpack.c.bf16 %v1544_v37, %v1541_v26  ;;  %v1680_v29 = vadd.f32 %v2760_v1, %v4243_v48 }
 0x2d6   : > { %v1671_v55 = vpop.f32.mrf.mxu1 }
 0x2d7   : > { %2623 = vst [vmem:[%s4251_s17 + $0x70] sm:$0xff] %v2492_v62   ;;  %v2577_v13 = vpack.c.bf16 %v1680_v29, %v1677_v19  ;;  %v1672_v3 = vadd.f32 %v1671_v55, %v4243_v48 }
 0x2d9   : > { %2640 = vst [vmem:[%s4251_s17 + $0xf8] sm:$0xff] %v2577_v13   ;;  %v2572_v40 = vpack.c.bf16 %v1672_v3, %v1669_v41 }
 0x2db   : > { %2639 = vst [vmem:[%s4251_s17 + $0xf0] sm:$0xff] %v2572_v40  }
 0x2dc   : > { %3090 = shalt.err (!%p3087_p6)
}
 0x2dd   : > { %s3091_s14 = scalar_lea.hbm %s4348_s8, 4096  ;;  %s3095_s23 = scalar_lea.hbm %s4405_s5, 8192 }
 0x2de   : > { %p3092_p9 = scmp.ne.s32.totalorder %s4348_s8, %s3091_s14  ;;  %p3096_p11 = scmp.lt.s32.totalorder %s4348_s8, %s4405_s5 }
 0x2df   : > { %p3097_p3 = scmp.lt.s32.totalorder %s3095_s23, %s3091_s14 }
 0x2e0   : > { %p3093_p12 = pnand %p3092_p9, %p3291_p0 }
 0x2e1   : > { %p3098_p1 = por %p3097_p3, %p3096_p11 }
 0x2e2   : > { %p3094_p13 = pneg %p3093_p12 }
 0x2e4   : > { %p3099_p4 = pnand %p3098_p1, %p3094_p13 }
 0x2e6   : > { %3102 = shalt.err (!%p3099_p4)
}
 0x2e7   : > { %s3173_s7 = smov 64   ;;  %s3174_s24 = smov 4  }
 0x2e8   : > { %2785 = dma.vmem_to_hbm [thread:$0]  (%p3291_p0), %s4350_s11, 4096, %s4348_s8, %s2004_s21, %s3173_s7, %s3173_s7, %s3174_s24  }
 0x2e9 PF: > { %s4592_s26 = sld [smem:[#allocation15_spill]]  ;;  %s2034_s10 = sand.u32 1, %s3145_s18  }
 0x2ea   : > { %s4593_s9 = sld [smem:[#allocation14_spill]]  ;;  %s2035_s17 = scalar_lea.sflag [#allocation4], %s2034_s10 }
 0x2ef   : > { %p4594_p8 = scmp.ne.s32.totalorder %s4592_s26, 0 }
 0x2f1   : > { %p2799_p5 = pnand %p2139_p10, %p4594_p8 }
 0x2f3   : > { %p2800_p7 = pneg %p2799_p5 }
 0x2f5   : > { %3140 = dma.done.wait (%p2800_p7), %s2035_s17, 4096  }
 0x2f6   : > { %3142 = vsyncadd (%p2800_p7), %s2035_s17, 4294963200  ;;  %s24_s23 = sadd.s32 1, %s4593_s9   ;;  %s4595_s29 = sld [smem:[#allocation13_spill]] }
 0x2f7   : > { %p21_p2 = scmp.ge.s32.totalorder %s24_s23, 4   ;;  %s4596_s20 = sld [smem:[#allocation17_spill]] }
 0x2f8   : > { %s4597_s15 = sld [smem:[#allocation16_spill]]  ;;  %s4598_s18 = smov %s3149_s19 }
 0x2f9   : > { %s4600_s21 = smov %s3161_s22 }
 0x2fa   :  { %23 = sbr.rel (!%p21_p2) target bundleno = 11 (0xb), region = 102 }
 0x2fc   : > { %s4599_s19 = smov %s4595_s29 }
 0x2fe   : > { %s4601_s22 = smov %s4597_s15 }
 0x2ff   :  { %2040 = vsyncpa [#allocation3], 1 }
 0x300   :  { %2042 = vsyncpa [#allocation3 + $0x1], 1 }
 0x301   :  { %2043 = vsyncpa [#allocation6], 1 }
 0x302   :  { %2045 = vsyncpa [#allocation6 + $0x1], 1 }
 0x303   :  { %2046 = vsyncpa [#allocation4], 1 }
 0x304   :  { %2048 = vsyncpa [#allocation4 + $0x1], 1 }

</bundles_post_ra>
